<compile_context>
chip_gen: v6e
topology: v6e:2x2x1
jax: 0.10.0
libtpu: 0.0.40
codegen_flags: <defaults>
</compile_context>

<pallas_src>
import functools

import jax
import jax.numpy as jnp
import numpy as np
from jax.experimental import pallas as pl
from jax.experimental.pallas import tpu as pltpu

LANE = 128


def _round_up(x, m):
    return ((x + m - 1) // m) * m


# ----------------------------------------------------------------------------
# Pallas kernel 1: conv-as-GEMM, fused bias + ReLU.
#   w: (Cout, K) bf16, patches: (K, M) bf16, b: (Cout, 1) f32
#   -> out (Cout, M) bf16, M = N*OH*OW  (lane-dense, already in CNHW order)
# ----------------------------------------------------------------------------
def _conv_gemm_kernel(w_ref, p_ref, b_ref, o_ref):
    acc = jnp.dot(w_ref[...], p_ref[...], preferred_element_type=jnp.float32)
    o_ref[...] = jnp.maximum(acc + b_ref[...], 0.0).astype(o_ref.dtype)


def conv_gemm(w_mat, patches, b_col):
    cout, k = w_mat.shape
    k2, m = patches.shape
    assert k == k2, (k, k2)
    cost = pl.CostEstimate(
        flops=2 * cout * k * m,
        transcendentals=0,
        bytes_accessed=(cout * k + k * m + cout * m) * 2 + cout * 4,
    )
    return pl.pallas_call(
        _conv_gemm_kernel,
        out_shape=jax.ShapeDtypeStruct((cout, m), jnp.bfloat16),
        in_specs=[
            pl.BlockSpec(memory_space=pltpu.MemorySpace.VMEM),
            pl.BlockSpec(memory_space=pltpu.MemorySpace.VMEM),
            pl.BlockSpec(memory_space=pltpu.MemorySpace.VMEM),
        ],
        out_specs=pl.BlockSpec(memory_space=pltpu.MemorySpace.VMEM),
        cost_estimate=cost,
    )(w_mat, patches, b_col)


# ----------------------------------------------------------------------------
# im2col on (C, N, H, W) activations -> (Cin*KH*KW, N*OH*OW) patch matrix.
# Feature index = c*KH*KW + kh*KW + kw  (matches torch w.reshape(Cout, -1)).
# ----------------------------------------------------------------------------
def _im2col_cnhw(a, ksize, stride):
    c, n, h, w = a.shape
    oh = (h - ksize) // stride + 1
    ow = (w - ksize) // stride + 1
    cols = [
        a[:, :, kh: kh + (oh - 1) * stride + 1: stride,
               kw: kw + (ow - 1) * stride + 1: stride]
        for kh in range(ksize) for kw in range(ksize)
    ]
    patches = jnp.stack(cols, axis=1)                      # (C, k*k, N, OH, OW)
    patches = patches.reshape(c * ksize * ksize, n * oh * ow)
    return patches, oh, ow


def conv2d_relu_cnhw(a, w_mat, b_col, *, ksize, stride):
    """a: (Cin, N, H, W) bf16; w_mat: (Cout, Cin*k*k) bf16; b_col: (Cout,1) f32."""
    _, n, _, _ = a.shape
    cout = w_mat.shape[0]
    patches, oh, ow = _im2col_cnhw(a, ksize, stride)
    y = conv_gemm(w_mat, patches, b_col)                   # (Cout, N*OH*OW) bf16
    return y.reshape(cout, n, oh, ow)                      # next layer's CNHW input


# ----------------------------------------------------------------------------
# Pallas kernel 2: fused FC1(+ReLU)+FC2, K-tiled over FC1's contraction dim.
#   x: (B, K_pad) bf16, w1: (K_pad, H) bf16, b1: (1, H) f32,
#   w2: (H, A_pad) bf16, b2: (1, A_pad) f32  ->  q: (B, A_pad) f32
# ----------------------------------------------------------------------------
def _fc_fused_kernel(x_ref, w1_ref, b1_ref, w2_ref, b2_ref, o_ref, acc_ref):
    k = pl.program_id(0)

    @pl.when(k == 0)
    def _():
        acc_ref[...] = jnp.zeros_like(acc_ref)

    acc_ref[...] += jnp.dot(x_ref[...], w1_ref[...],
                            preferred_element_type=jnp.float32)

    @pl.when(k == pl.num_programs(0) - 1)
    def _():
        h = jnp.maximum(acc_ref[...] + b1_ref[...], 0.0)         # f32 epilogue
        q = jnp.dot(h.astype(w2_ref.dtype), w2_ref[...],
                    preferred_element_type=jnp.float32) + b2_ref[...]
        o_ref[...] = q.astype(o_ref.dtype)


def _pick_tk(k_pad, max_tk=1024):
    tk = k_pad
    for cand in range(LANE, min(k_pad, max_tk) + 1, LANE):
        if k_pad % cand == 0:
            tk = cand
    return tk


def fc_fused(x_pad, w1, b1, w2, b2, *, tk):
    b, k_pad = x_pad.shape
    k2, h = w1.shape
    h2, a_pad = w2.shape
    assert k_pad == k2 and h == h2
    assert k_pad % tk == 0 and tk % LANE == 0 and a_pad % LANE == 0
    nk = k_pad // tk
    cost = pl.CostEstimate(
        flops=2 * b * k_pad * h + 2 * b * h * a_pad,
        transcendentals=0,
        bytes_accessed=(b * k_pad + k_pad * h + h * a_pad) * 2
        + (h + a_pad + b * a_pad) * 4,
    )
    return pl.pallas_call(
        _fc_fused_kernel,
        out_shape=jax.ShapeDtypeStruct((b, a_pad), jnp.float32),
        grid_spec=pltpu.PrefetchScalarGridSpec(
            num_scalar_prefetch=0,
            grid=(nk,),
            in_specs=[
                pl.BlockSpec((b, tk), lambda i: (0, i)),      # activation slab
                pl.BlockSpec((tk, h), lambda i: (0 + i, 0)),  # fc1 weight slab
                pl.BlockSpec((1, h), lambda i: (0, 0)),       # fc1 bias (resident)
                pl.BlockSpec((h, a_pad), lambda i: (0, 0)),   # fc2 weight (resident)
                pl.BlockSpec((1, a_pad), lambda i: (0, 0)),   # fc2 bias (resident)
            ],
            out_specs=pl.BlockSpec((b, a_pad), lambda i: (0, 0)),
            scratch_shapes=[pltpu.VMEM((b, h), jnp.float32)],
        ),
        compiler_params=pltpu.CompilerParams(
            dimension_semantics=("arbitrary",)),
        cost_estimate=cost,
    )(x_pad, w1, b1, w2, b2)


# ----------------------------------------------------------------------------
# Parameters: raw (torch layout, f32) + one-time packing for the kernels.
# ----------------------------------------------------------------------------
def init_dqn_params_raw(key, input_shape, n_actions):
    c_in, h, w = input_shape

    def conv_out(s, k, st):
        return (s - k) // st + 1

    h1, w1 = conv_out(h, 8, 4), conv_out(w, 8, 4)
    h2, w2 = conv_out(h1, 4, 2), conv_out(w1, 4, 2)
    h3, w3 = conv_out(h2, 3, 1), conv_out(w2, 3, 1)
    conv_out_size = 64 * h3 * w3

    def uinit(key, shape, fan_in):
        bound = 1.0 / np.sqrt(fan_in)
        return jax.random.uniform(key, shape, jnp.float32, -bound, bound)

    keys = jax.random.split(key, 10)
    return {
        "conv1_w": uinit(keys[0], (32, c_in, 8, 8), c_in * 8 * 8),
        "conv1_b": uinit(keys[1], (32,), c_in * 8 * 8),
        "conv2_w": uinit(keys[2], (64, 32, 4, 4), 32 * 4 * 4),
        "conv2_b": uinit(keys[3], (64,), 32 * 4 * 4),
        "conv3_w": uinit(keys[4], (64, 64, 3, 3), 64 * 3 * 3),
        "conv3_b": uinit(keys[5], (64,), 64 * 3 * 3),
        "fc1_w": uinit(keys[6], (512, conv_out_size), conv_out_size),
        "fc1_b": uinit(keys[7], (512,), conv_out_size),
        "fc2_w": uinit(keys[8], (n_actions, 512), 512),
        "fc2_b": uinit(keys[9], (n_actions,), 512),
    }


def pack_params(raw):
    """One-time re-layout: pre-reshape/pre-transpose/pad, bf16 MXU operands."""
    bf16 = lambda a: a.astype(jnp.bfloat16)

    hdim, k = raw["fc1_w"].shape                    # (512, conv_out_size)
    k_pad = _round_up(k, LANE)
    n_actions = raw["fc2_w"].shape[0]
    a_pad = _round_up(max(n_actions, LANE), LANE)

    fc1_w = jnp.zeros((k_pad, hdim), jnp.float32).at[:k, :].set(raw["fc1_w"].T)
    fc2_w = jnp.zeros((hdim, a_pad), jnp.float32).at[:, :n_actions].set(raw["fc2_w"].T)
    fc2_b = jnp.zeros((1, a_pad), jnp.float32).at[0, :n_actions].set(raw["fc2_b"])

    packed = {
        "conv1_w": bf16(raw["conv1_w"].reshape(raw["conv1_w"].shape[0], -1)),
        "conv1_b": raw["conv1_b"].reshape(-1, 1),
        "conv2_w": bf16(raw["conv2_w"].reshape(raw["conv2_w"].shape[0], -1)),
        "conv2_b": raw["conv2_b"].reshape(-1, 1),
        "conv3_w": bf16(raw["conv3_w"].reshape(raw["conv3_w"].shape[0], -1)),
        "conv3_b": raw["conv3_b"].reshape(-1, 1),
        "fc1_w": bf16(fc1_w),
        "fc1_b": raw["fc1_b"].reshape(1, -1),
        "fc2_w": bf16(fc2_w),
        "fc2_b": fc2_b,
    }
    return packed, n_actions


# ----------------------------------------------------------------------------
# Forward pass
# ----------------------------------------------------------------------------
@functools.partial(jax.jit, static_argnames=("n_actions",))
def dqn_forward(packed, x, *, n_actions):
    """x: (N, C, H, W) -> (N, n_actions) f32 Q-values."""
    # NCHW -> (C, N, H, W) once; all conv stages stay in this layout.
    a = jnp.transpose(x.astype(jnp.bfloat16), (1, 0, 2, 3))
    a = conv2d_relu_cnhw(a, packed["conv1_w"], packed["conv1_b"], ksize=8, stride=4)
    a = conv2d_relu_cnhw(a, packed["conv2_w"], packed["conv2_b"], ksize=4, stride=2)
    a = conv2d_relu_cnhw(a, packed["conv3_w"], packed["conv3_b"], ksize=3, stride=1)
    # (C, N, OH, OW) -> (N, C*OH*OW): matches torch's NCHW .view flatten.
    n = a.shape[1]
    fc_in = jnp.transpose(a, (1, 0, 2, 3)).reshape(n, -1)
    k_pad = packed["fc1_w"].shape[0]
    fc_in = jnp.pad(fc_in, ((0, 0), (0, k_pad - fc_in.shape[1])))
    q = fc_fused(fc_in, packed["fc1_w"], packed["fc1_b"],
                 packed["fc2_w"], packed["fc2_b"], tk=_pick_tk(k_pad))
    return q[:, :n_actions]


# ----------------------------------------------------------------------------
# Pure-JAX f32 reference (same bf16-rounded weights, f32 activations/compute).
# ----------------------------------------------------------------------------
def dqn_forward_ref(raw, x):
    x = x.astype(jnp.float32)
    rnd = lambda w: w.astype(jnp.bfloat16).astype(jnp.float32)

    def conv(x, w, b, s):
        y = jax.lax.conv_general_dilated(
            x, rnd(w), window_strides=(s, s), padding="VALID",
            dimension_numbers=("NCHW", "OIHW", "NCHW"))
        return jax.nn.relu(y + b[None, :, None, None])

    x = conv(x, raw["conv1_w"], raw["conv1_b"], 4)
    x = conv(x, raw["conv2_w"], raw["conv2_b"], 2)
    x = conv(x, raw["conv3_w"], raw["conv3_b"], 1)
    x = x.reshape(x.shape[0], -1)
    x = jax.nn.relu(x @ rnd(raw["fc1_w"]).T + raw["fc1_b"])
    x = x @ rnd(raw["fc2_w"]).T + raw["fc2_b"]
    return x


if __name__ == "__main__":
    # Wrapped Contra env observations: 4 stacked grayscale 84x84 frames;
    # RIGHT_ONLY -> 5 actions.
    batch, input_shape, n_actions = 2, (4, 84, 84), 5

    key = jax.random.PRNGKey(0)
    k_param, k_x = jax.random.split(key)
    raw = init_dqn_params_raw(k_param, input_shape, n_actions)
    packed, n_act = pack_params(raw)
    assert n_act == n_actions
    x = jax.random.uniform(k_x, (batch, *input_shape), jnp.float32, 0.0, 1.0)

    out = dqn_forward(packed, x, n_actions=n_actions)
    out = jax.block_until_ready(out)
    assert out.shape == (batch, n_actions), out.shape

    ref = dqn_forward_ref(raw, x)
    # bf16 activations in the kernels vs f32 reference -> loosened tolerance.
    np.testing.assert_allclose(np.asarray(out), np.asarray(ref), rtol=2e-2, atol=2e-2)

    print("KERNEL_OK")
</pallas_src>

<mosaic_0001>
module attributes {stable_mosaic.version = 11 : i64} {
  func.func @_conv_gemm_kernel(%arg0: memref<32x256xbf16, #tpu.memory_space<vmem>>, %arg1: memref<256x800xbf16, #tpu.memory_space<vmem>>, %arg2: memref<32x1xf32, #tpu.memory_space<vmem>>, %arg3: memref<32x800xbf16, #tpu.memory_space<vmem>>) attributes {dimension_semantics = [], scalar_prefetch = 0 : i64, scratch_operands = 0 : i64, tpu.core_type = #tpu.core_type<tc>} {
    %c0 = arith.constant 0 : index
    %c0_0 = arith.constant 0 : index
    %0 = vector.load %arg0[%c0, %c0_0] : memref<32x256xbf16, #tpu.memory_space<vmem>>, vector<32x256xbf16>
    %c0_1 = arith.constant 0 : index
    %c0_2 = arith.constant 0 : index
    %1 = vector.load %arg1[%c0_1, %c0_2] : memref<256x800xbf16, #tpu.memory_space<vmem>>, vector<256x800xbf16>
    %cst = arith.constant dense<0.000000e+00> : vector<32x800xf32>
    %2 = tpu.matmul %0, %1, %cst {dimension_numbers = #tpu.dot_dimension_numbers<[1], [0], [0], [1], [0, 0, 1, 1], [], []>} : vector<32x256xbf16>, vector<256x800xbf16>, vector<32x800xf32> -> vector<32x800xf32>
    %c0_3 = arith.constant 0 : index
    %c0_4 = arith.constant 0 : index
    %3 = vector.load %arg2[%c0_3, %c0_4] : memref<32x1xf32, #tpu.memory_space<vmem>>, vector<32x1xf32>
    %4 = vector.broadcast %3 : vector<32x1xf32> to vector<32x800xf32>
    %5 = arith.addf %2, %4 : vector<32x800xf32>
    %cst_5 = arith.constant 0.000000e+00 : f32
    %6 = vector.broadcast %cst_5 : f32 to vector<32x800xf32>
    %7 = arith.maximumf %5, %6 : vector<32x800xf32>
    %8 = arith.truncf %7 : vector<32x800xf32> to vector<32x800xbf16>
    %c0_6 = arith.constant 0 : index
    %c0_7 = arith.constant 0 : index
    %9 = vector.load %arg3[%c0_6, %c0_7] : memref<32x800xbf16, #tpu.memory_space<vmem>>, vector<32x800xbf16>
    tpu.vector_store %arg3[%c0_6, %c0_7], %8 {strides = array<i32>} : memref<32x800xbf16, #tpu.memory_space<vmem>>, vector<32x800xbf16>,
    return
  }
}

module attributes {stable_mosaic.version = 11 : i64} {
  func.func @_conv_gemm_kernel(%arg0: memref<64x512xbf16, #tpu.memory_space<vmem>>, %arg1: memref<512x162xbf16, #tpu.memory_space<vmem>>, %arg2: memref<64x1xf32, #tpu.memory_space<vmem>>, %arg3: memref<64x162xbf16, #tpu.memory_space<vmem>>) attributes {dimension_semantics = [], scalar_prefetch = 0 : i64, scratch_operands = 0 : i64, tpu.core_type = #tpu.core_type<tc>} {
    %c0 = arith.constant 0 : index
    %c0_0 = arith.constant 0 : index
    %0 = vector.load %arg0[%c0, %c0_0] : memref<64x512xbf16, #tpu.memory_space<vmem>>, vector<64x512xbf16>
    %c0_1 = arith.constant 0 : index
    %c0_2 = arith.constant 0 : index
    %1 = vector.load %arg1[%c0_1, %c0_2] : memref<512x162xbf16, #tpu.memory_space<vmem>>, vector<512x162xbf16>
    %cst = arith.constant dense<0.000000e+00> : vector<64x162xf32>
    %2 = tpu.matmul %0, %1, %cst {dimension_numbers = #tpu.dot_dimension_numbers<[1], [0], [0], [1], [0, 0, 1, 1], [], []>} : vector<64x512xbf16>, vector<512x162xbf16>, vector<64x162xf32> -> vector<64x162xf32>
    %c0_3 = arith.constant 0 : index
    %c0_4 = arith.constant 0 : index
    %3 = vector.load %arg2[%c0_3, %c0_4] : memref<64x1xf32, #tpu.memory_space<vmem>>, vector<64x1xf32>
    %4 = vector.broadcast %3 : vector<64x1xf32> to vector<64x162xf32>
    %5 = arith.addf %2, %4 : vector<64x162xf32>
    %cst_5 = arith.constant 0.000000e+00 : f32
    %6 = vector.broadcast %cst_5 : f32 to vector<64x162xf32>
    %7 = arith.maximumf %5, %6 : vector<64x162xf32>
    %8 = arith.truncf %7 : vector<64x162xf32> to vector<64x162xbf16>
    %c0_6 = arith.constant 0 : index
    %c0_7 = arith.constant 0 : index
    %9 = vector.load %arg3[%c0_6, %c0_7] : memref<64x162xbf16, #tpu.memory_space<vmem>>, vector<64x162xbf16>
    tpu.vector_store %arg3[%c0_6, %c0_7], %8 {strides = array<i32>} : memref<64x162xbf16, #tpu.memory_space<vmem>>, vector<64x162xbf16>,
    return
  }
}

module attributes {stable_mosaic.version = 11 : i64} {
  func.func @_conv_gemm_kernel(%arg0: memref<64x576xbf16, #tpu.memory_space<vmem>>, %arg1: memref<576x98xbf16, #tpu.memory_space<vmem>>, %arg2: memref<64x1xf32, #tpu.memory_space<vmem>>, %arg3: memref<64x98xbf16, #tpu.memory_space<vmem>>) attributes {dimension_semantics = [], scalar_prefetch = 0 : i64, scratch_operands = 0 : i64, tpu.core_type = #tpu.core_type<tc>} {
    %c0 = arith.constant 0 : index
    %c0_0 = arith.constant 0 : index
    %0 = vector.load %arg0[%c0, %c0_0] : memref<64x576xbf16, #tpu.memory_space<vmem>>, vector<64x576xbf16>
    %c0_1 = arith.constant 0 : index
    %c0_2 = arith.constant 0 : index
    %1 = vector.load %arg1[%c0_1, %c0_2] : memref<576x98xbf16, #tpu.memory_space<vmem>>, vector<576x98xbf16>
    %cst = arith.constant dense<0.000000e+00> : vector<64x98xf32>
    %2 = tpu.matmul %0, %1, %cst {dimension_numbers = #tpu.dot_dimension_numbers<[1], [0], [0], [1], [0, 0, 1, 1], [], []>} : vector<64x576xbf16>, vector<576x98xbf16>, vector<64x98xf32> -> vector<64x98xf32>
    %c0_3 = arith.constant 0 : index
    %c0_4 = arith.constant 0 : index
    %3 = vector.load %arg2[%c0_3, %c0_4] : memref<64x1xf32, #tpu.memory_space<vmem>>, vector<64x1xf32>
    %4 = vector.broadcast %3 : vector<64x1xf32> to vector<64x98xf32>
    %5 = arith.addf %2, %4 : vector<64x98xf32>
    %cst_5 = arith.constant 0.000000e+00 : f32
    %6 = vector.broadcast %cst_5 : f32 to vector<64x98xf32>
    %7 = arith.maximumf %5, %6 : vector<64x98xf32>
    %8 = arith.truncf %7 : vector<64x98xf32> to vector<64x98xbf16>
    %c0_6 = arith.constant 0 : index
    %c0_7 = arith.constant 0 : index
    %9 = vector.load %arg3[%c0_6, %c0_7] : memref<64x98xbf16, #tpu.memory_space<vmem>>, vector<64x98xbf16>
    tpu.vector_store %arg3[%c0_6, %c0_7], %8 {strides = array<i32>} : memref<64x98xbf16, #tpu.memory_space<vmem>>, vector<64x98xbf16>,
    return
  }
}

module attributes {stable_mosaic.version = 11 : i64} {
  func.func @_fc_fused_kernel(%arg0: i32, %arg1: memref<2x640xbf16, #tpu.memory_space<vmem>>, %arg2: memref<640x512xbf16, #tpu.memory_space<vmem>>, %arg3: memref<1x512xf32, #tpu.memory_space<vmem>>, %arg4: memref<512x128xbf16, #tpu.memory_space<vmem>>, %arg5: memref<1x128xf32, #tpu.memory_space<vmem>>, %arg6: memref<2x128xf32, #tpu.memory_space<vmem>>, %arg7: memref<2x512xf32, #tpu.memory_space<vmem>>) attributes {dimension_semantics = [#tpu.dimension_semantics<arbitrary>], iteration_bounds = array<i64: 5>, scalar_prefetch = 0 : i64, scratch_operands = 1 : i64, tpu.core_type = #tpu.core_type<tc>, window_params = [{transform_indices = @transform_0, window_bounds = array<i64: 2, 640>}, {transform_indices = @transform_1, window_bounds = array<i64: 640, 512>}, {pipeline_mode = #tpu.pipeline_mode<synchronous>, transform_indices = @transform_2, window_bounds = array<i64: 1, 512>}, {pipeline_mode = #tpu.pipeline_mode<synchronous>, transform_indices = @transform_3, window_bounds = array<i64: 512, 128>}, {pipeline_mode = #tpu.pipeline_mode<synchronous>, transform_indices = @transform_4, window_bounds = array<i64: 1, 128>}, {pipeline_mode = #tpu.pipeline_mode<synchronous>, transform_indices = @transform_5, window_bounds = array<i64: 2, 128>}]} {
    %c0_i32 = arith.constant 0 : i32
    %0 = arith.cmpi eq, %arg0, %c0_i32 : i32
    %1 = arith.extui %0 : i1 to i32
    %c0_i32_0 = arith.constant 0 : i32
    %2 = arith.cmpi ne, %1, %c0_i32_0 : i32
    scf.if %2 {
      %cst_9 = arith.constant 0.000000e+00 : f32
      %12 = vector.broadcast %cst_9 : f32 to vector<2x512xf32>
      %c0_10 = arith.constant 0 : index
      %c0_11 = arith.constant 0 : index
      %13 = vector.load %arg7[%c0_10, %c0_11] : memref<2x512xf32, #tpu.memory_space<vmem>>, vector<2x512xf32>
      tpu.vector_store %arg7[%c0_10, %c0_11], %12 {strides = array<i32>} : memref<2x512xf32, #tpu.memory_space<vmem>>, vector<2x512xf32>,
    } else {
    }
    %c0 = arith.constant 0 : index
    %c0_1 = arith.constant 0 : index
    %3 = vector.load %arg7[%c0, %c0_1] : memref<2x512xf32, #tpu.memory_space<vmem>>, vector<2x512xf32>
    %c0_2 = arith.constant 0 : index
    %c0_3 = arith.constant 0 : index
    %4 = vector.load %arg1[%c0_2, %c0_3] : memref<2x640xbf16, #tpu.memory_space<vmem>>, vector<2x640xbf16>
    %c0_4 = arith.constant 0 : index
    %c0_5 = arith.constant 0 : index
    %5 = vector.load %arg2[%c0_4, %c0_5] : memref<640x512xbf16, #tpu.memory_space<vmem>>, vector<640x512xbf16>
    %cst = arith.constant dense<0.000000e+00> : vector<2x512xf32>
    %6 = tpu.matmul %4, %5, %cst {dimension_numbers = #tpu.dot_dimension_numbers<[1], [0], [0], [1], [0, 0, 1, 1], [], []>} : vector<2x640xbf16>, vector<640x512xbf16>, vector<2x512xf32> -> vector<2x512xf32>
    %7 = arith.addf %3, %6 : vector<2x512xf32>
    %c0_6 = arith.constant 0 : index
    %c0_7 = arith.constant 0 : index
    %8 = vector.load %arg7[%c0_6, %c0_7] : memref<2x512xf32, #tpu.memory_space<vmem>>, vector<2x512xf32>
    tpu.vector_store %arg7[%c0_6, %c0_7], %7 {strides = array<i32>} : memref<2x512xf32, #tpu.memory_space<vmem>>, vector<2x512xf32>,
    %c4_i32 = arith.constant 4 : i32
    %9 = arith.cmpi eq, %arg0, %c4_i32 : i32
    %10 = arith.extui %9 : i1 to i32
    %c0_i32_8 = arith.constant 0 : i32
    %11 = arith.cmpi ne, %10, %c0_i32_8 : i32
    scf.if %11 {
      %c0_9 = arith.constant 0 : index
      %c0_10 = arith.constant 0 : index
      %12 = vector.load %arg7[%c0_9, %c0_10] : memref<2x512xf32, #tpu.memory_space<vmem>>, vector<2x512xf32>
      %c0_11 = arith.constant 0 : index
      %c0_12 = arith.constant 0 : index
      %13 = vector.load %arg3[%c0_11, %c0_12] : memref<1x512xf32, #tpu.memory_space<vmem>>, vector<1x512xf32>
      %14 = vector.broadcast %13 : vector<1x512xf32> to vector<2x512xf32>
      %15 = arith.addf %12, %14 : vector<2x512xf32>
      %cst_13 = arith.constant 0.000000e+00 : f32
      %16 = vector.broadcast %cst_13 : f32 to vector<2x512xf32>
      %17 = arith.maximumf %15, %16 : vector<2x512xf32>
      %18 = arith.truncf %17 : vector<2x512xf32> to vector<2x512xbf16>
      %c0_14 = arith.constant 0 : index
      %c0_15 = arith.constant 0 : index
      %19 = vector.load %arg4[%c0_14, %c0_15] : memref<512x128xbf16, #tpu.memory_space<vmem>>, vector<512x128xbf16>
      %cst_16 = arith.constant dense<0.000000e+00> : vector<2x128xf32>
      %20 = tpu.matmul %18, %19, %cst_16 {dimension_numbers = #tpu.dot_dimension_numbers<[1], [0], [0], [1], [0, 0, 1, 1], [], []>} : vector<2x512xbf16>, vector<512x128xbf16>, vector<2x128xf32> -> vector<2x128xf32>
      %c0_17 = arith.constant 0 : index
      %c0_18 = arith.constant 0 : index
      %21 = vector.load %arg5[%c0_17, %c0_18] : memref<1x128xf32, #tpu.memory_space<vmem>>, vector<1x128xf32>
      %22 = vector.broadcast %21 : vector<1x128xf32> to vector<2x128xf32>
      %23 = arith.addf %20, %22 : vector<2x128xf32>
      %c0_19 = arith.constant 0 : index
      %c0_20 = arith.constant 0 : index
      %24 = vector.load %arg6[%c0_19, %c0_20] : memref<2x128xf32, #tpu.memory_space<vmem>>, vector<2x128xf32>
      tpu.vector_store %arg6[%c0_19, %c0_20], %23 {strides = array<i32>} : memref<2x128xf32, #tpu.memory_space<vmem>>, vector<2x128xf32>,
    } else {
    }
    return
  }
  func.func @transform_0(%arg0: i32) -> (i32, i32) {
    %c0_i32 = arith.constant 0 : i32
    %c0_i32_0 = arith.constant 0 : i32
    return %c0_i32, %arg0 : i32, i32
  }
  func.func @transform_1(%arg0: i32) -> (i32, i32) {
    %c0_i32 = arith.constant 0 : i32
    %0 = arith.addi %c0_i32, %arg0 : i32
    %c0_i32_0 = arith.constant 0 : i32
    %c0_i32_1 = arith.constant 0 : i32
    return %0, %c0_i32_0 : i32, i32
  }
  func.func @transform_2(%arg0: i32) -> (i32, i32) {
    %c0_i32 = arith.constant 0 : i32
    %c0_i32_0 = arith.constant 0 : i32
    %c0_i32_1 = arith.constant 0 : i32
    return %c0_i32, %c0_i32_0 : i32, i32
  }
  func.func @transform_3(%arg0: i32) -> (i32, i32) {
    %c0_i32 = arith.constant 0 : i32
    %c0_i32_0 = arith.constant 0 : i32
    %c0_i32_1 = arith.constant 0 : i32
    return %c0_i32, %c0_i32_0 : i32, i32
  }
  func.func @transform_4(%arg0: i32) -> (i32, i32) {
    %c0_i32 = arith.constant 0 : i32
    %c0_i32_0 = arith.constant 0 : i32
    %c0_i32_1 = arith.constant 0 : i32
    return %c0_i32, %c0_i32_0 : i32, i32
  }
  func.func @transform_5(%arg0: i32) -> (i32, i32) {
    %c0_i32 = arith.constant 0 : i32
    %c0_i32_0 = arith.constant 0 : i32
    %c0_i32_1 = arith.constant 0 : i32
    return %c0_i32, %c0_i32_0 : i32, i32
  }
}

</mosaic_0001>

<bundles_post_ra>
// kernel: dqn_forward.4
= control target key start
LH: loop header
LB: loop body
LE: loop exit
PB: predicated region body
PF: predicated region fallthrough
CT: control target
= control target key end

     0   :  { %v1457_v4 = vmov 0   ;;  %vm1094_vm0 = vcmask 257024   ;;  %s1950_s1 = inlined_call_operand.vmem [shape: bf16[256,800], index: 1, kind: input, shape index: {}]   ;;  %s1951_s0 = inlined_call_operand.vmem [shape: bf16[32,256], index: 0, kind: input, shape index: {}]   ;;  %s1952_s2 = inlined_call_operand.vmem [shape: f32[32,1], index: 2, kind: input, shape index: {}]   ;;  %s1953_s3 = inlined_call_operand.vmem [shape: bf16[32,800], index: 3, kind: output, shape index: {}]  }
   0x1   :  { %v1291_v0 = vld [vmem:[%s1950_s1 + $0x18c] ss:$28 sps:$4 sm:$0xff]   ;;  %v1294_v2 = vld [vmem:[%s1950_s1 + $0x154] ss:$28 sps:$4 sm:$0xff]   ;;  %1289 = vset.pattern.permute.xlu0 %v1457_v4  ;;  %v1297_v5 = vld [vmem:[%s1950_s1 + $0x11c] ss:$28 sps:$4 sm:$0xff]   ;;  %1290 = vset.pattern.permute.xlu1 %v1457_v4 }
   0x2   :  { %v1293_v1 = vld [vmem:[%s1950_s1 + $0x188] ss:$28 sps:$4 sm:$0xff]   ;;  %767 = vmatprep.subr.bf16.mxu0 %v1291_v0  ;;  %v1296_v3 = vld [vmem:[%s1950_s1 + $0x150] ss:$28 sps:$4 sm:$0xff]   ;;  %v1299_v6 = vld [vmem:[%s1950_s1 + $0x118] ss:$28 sps:$4 sm:$0xff]  }
   0x3   :  { %768 = vmatpush1.bf16.msra.mxu0 %v1293_v1  ;;  %v1300_v7 = vld [vmem:[%s1950_s1 + $0xe4] ss:$28 sps:$4 sm:$0xff]   ;;  %v1311_v8 = vld [vmem:[%s1950_s1 + $0x194] ss:$28 sps:$4 sm:$0xff]   ;;  %v1303_v11 = vld [vmem:[%s1950_s1 + $0xac] ss:$28 sps:$4 sm:$0xff]  }
   0x4   :  { %769 = vmatprep.subr.bf16.mxu0 %v1294_v2  ;;  %v1314_v9 = vld [vmem:[%s1950_s1 + $0x190] ss:$28 sps:$4 sm:$0xff]   ;;  %v1302_v10 = vld [vmem:[%s1950_s1 + $0xe0] ss:$28 sps:$4 sm:$0xff]   ;;  %820 = vmatprep.subr.bf16.mxu1 %v1311_v8  ;;  %v1320_v13 = vld [vmem:[%s1950_s1 + $0x158] ss:$28 sps:$4 sm:$0xff]  }
   0x5   :  { %821 = vmatpush1.bf16.msra.mxu1 %v1314_v9  ;;  %v1317_v12 = vld [vmem:[%s1950_s1 + $0x15c] ss:$28 sps:$4 sm:$0xff]   ;;  %v1305_v14 = vld [vmem:[%s1950_s1 + $0xa8] ss:$28 sps:$4 sm:$0xff]   ;;  %v1306_v15 = vld [vmem:[%s1950_s1 + $0x74] ss:$28 sps:$4 sm:$0xff]  }
   0x6   :  { %822 = vmatprep.subr.bf16.mxu1 %v1317_v12  ;;  %v1323_v16 = vld [vmem:[%s1950_s1 + $0x124] ss:$28 sps:$4 sm:$0xff]   ;;  %v1329_v18 = vld [vmem:[%s1950_s1 + $0xec] ss:$28 sps:$4 sm:$0xff]   ;;  %v1309_v20 = vld [vmem:[%s1950_s1 + $0x3c] ss:$28 sps:$4 sm:$0xff]  }
   0x7   :  { %770 = vmatpush1.bf16.msra.mxu0 %v1296_v3  ;;  %v1326_v17 = vld [vmem:[%s1950_s1 + $0x120] ss:$28 sps:$4 sm:$0xff]   ;;  %v1308_v19 = vld [vmem:[%s1950_s1 + $0x70] ss:$28 sps:$4 sm:$0xff]   ;;  %v1332_v21 = vld [vmem:[%s1950_s1 + $0xe8] ss:$28 sps:$4 sm:$0xff]  }
   0x8   :  { %771 = vmatprep.subr.bf16.mxu0 %v1297_v5  ;;  %v1335_v22 = vld [vmem:[%s1950_s1 + $0xb4] ss:$28 sps:$4 sm:$0xff]   ;;  %v1315_v24 = vld [vmem:[%s1950_s1 + $0x4] ss:$28 sps:$4 sm:$0xff]   ;;  %v1341_v26 = vld [vmem:[%s1950_s1 + $0x7c] ss:$28 sps:$4 sm:$0xff]  }
   0x9   :  { %823 = vmatpush1.bf16.msra.mxu1 %v1320_v13  ;;  %v1313_v23 = vld [vmem:[%s1950_s1 + $0x38] ss:$28 sps:$4 sm:$0xff]   ;;  %v1338_v25 = vld [vmem:[%s1950_s1 + $0xb0] ss:$28 sps:$4 sm:$0xff]   ;;  %v1319_v27 = vld [vmem:[%s1950_s1] ss:$28 sps:$4 sm:$0xff]  }
   0xa   :  { %824 = vmatprep.subr.bf16.mxu1 %v1323_v16  ;;  %v1321_v28 = vld [vmem:[%s1950_s1 + $0x34c] ss:$28 sps:$4 sm:$0xff]   ;;  %v1344_v29 = vld [vmem:[%s1950_s1 + $0x78] ss:$28 sps:$4 sm:$0xff]   ;;  %v1347_v30 = vld [vmem:[%s1950_s1 + $0x44] ss:$28 sps:$4 sm:$0xff]  }
   0xb   :  { %772 = vmatpush1.bf16.msra.mxu0 %v1299_v6  ;;  %v1325_v31 = vld [vmem:[%s1950_s1 + $0x348] ss:$28 sps:$4 sm:$0xff]   ;;  %v1327_v32 = vld [vmem:[%s1950_s1 + $0x314] ss:$28 sps:$4 sm:$0xff]   ;;  %v1350_v33 = vld [vmem:[%s1950_s1 + $0x40] ss:$28 sps:$4 sm:$0xff]  }
   0xc   :  { %773 = vmatprep.subr.bf16.mxu0 %v1300_v7  ;;  %v1353_v34 = vld [vmem:[%s1950_s1 + $0xc] ss:$28 sps:$4 sm:$0xff]   ;;  %v1333_v36 = vld [vmem:[%s1950_s1 + $0x2dc] ss:$28 sps:$4 sm:$0xff]   ;;  %v1359_v39 = vld [vmem:[%s1950_s1 + $0x354] ss:$28 sps:$4 sm:$0xff]  }
   0xd   :  { %825 = vmatpush1.bf16.msra.mxu1 %v1326_v17  ;;  %v1331_v35 = vld [vmem:[%s1950_s1 + $0x310] ss:$28 sps:$4 sm:$0xff]   ;;  %v1356_v38 = vld [vmem:[%s1950_s1 + $0x8] ss:$28 sps:$4 sm:$0xff]   ;;  %v1337_v40 = vld [vmem:[%s1950_s1 + $0x2d8] ss:$28 sps:$4 sm:$0xff]  }
   0xe   :  { %826 = vmatprep.subr.bf16.mxu1 %v1329_v18  ;;  %v1589_v37 = vld [vmem:[%s1951_s0 + $0x4] ss:$8 sps:$4 sm:$0xff]   ;;  %v1365_v43 = vld [vmem:[%s1950_s1 + $0x31c] ss:$28 sps:$4 sm:$0xff]   ;;  %v1351_v49 = vld [vmem:[%s1950_s1 + $0x234] ss:$28 sps:$4 sm:$0xff]  }
   0xf   :  { %774 = vmatpush1.bf16.msra.mxu0 %v1302_v10  ;;  %799 = vmatprep.mubr.bf16.mxu0 %v1589_v37  ;;  %v1339_v41 = vld [vmem:[%s1950_s1 + $0x2a4] ss:$28 sps:$4 sm:$0xff]   ;;  %v1362_v42 = vld [vmem:[%s1950_s1 + $0x350] ss:$28 sps:$4 sm:$0xff]   ;;  %v1368_v46 = vld [vmem:[%s1950_s1 + $0x318] ss:$28 sps:$4 sm:$0xff]  }
  0x10   :  { %775 = vmatprep.subr.bf16.mxu0 %v1303_v11  ;;  %852 = vmatprep.mubr.bf16.mxu1 %v1589_v37  ;;  %v1343_v44 = vld [vmem:[%s1950_s1 + $0x2a0] ss:$28 sps:$4 sm:$0xff]   ;;  %v1345_v45 = vld [vmem:[%s1950_s1 + $0x26c] ss:$28 sps:$4 sm:$0xff]   ;;  %v1384_v55 = vld [vmem:[%s1950_s1 + $0x274] ss:$28 sps:$4 sm:$0xff]  }
  0x11   :  { %827 = vmatpush1.bf16.msra.mxu1 %v1332_v21  ;;  %v1372_v47 = vld [vmem:[%s1950_s1 + $0x2e4] ss:$28 sps:$4 sm:$0xff]   ;;  %v1378_v51 = vld [vmem:[%s1950_s1 + $0x2ac] ss:$28 sps:$4 sm:$0xff]   ;;  %v1357_v53 = vld [vmem:[%s1950_s1 + $0x1fc] ss:$28 sps:$4 sm:$0xff]  }
  0x12   :  { %828 = vmatprep.subr.bf16.mxu1 %v1335_v22  ;;  %v1349_v48 = vld [vmem:[%s1950_s1 + $0x268] ss:$28 sps:$4 sm:$0xff]   ;;  %v1377_v50 = vld [vmem:[%s1950_s1 + $0x2e0] ss:$28 sps:$4 sm:$0xff]   ;;  %v1355_v52 = vld [vmem:[%s1950_s1 + $0x230] ss:$28 sps:$4 sm:$0xff]  }
  0x13   :  { %776 = vmatpush1.bf16.msra.mxu0 %v1305_v14  ;;  %v1383_v54 = vld [vmem:[%s1950_s1 + $0x2a8] ss:$28 sps:$4 sm:$0xff]   ;;  %v1361_v56 = vld [vmem:[%s1950_s1 + $0x1f8] ss:$28 sps:$4 sm:$0xff]   ;;  %v1389_v58 = vld [vmem:[%s1950_s1 + $0x270] ss:$28 sps:$4 sm:$0xff]  }
  0x14   :  { %777 = vmatprep.subr.bf16.mxu0 %v1306_v15  ;;  %v1363_v57 = vld [vmem:[%s1950_s1 + $0x1c4] ss:$28 sps:$4 sm:$0xff]   ;;  %v1390_v59 = vld [vmem:[%s1950_s1 + $0x23c] ss:$28 sps:$4 sm:$0xff]   ;;  %v1402_v4 = vld [vmem:[%s1950_s1 + $0x1cc] ss:$28 sps:$4 sm:$0xff]  }
  0x15   :  { %829 = vmatpush1.bf16.msra.mxu1 %v1338_v25  ;;  %v1367_v60 = vld [vmem:[%s1950_s1 + $0x1c0] ss:$28 sps:$4 sm:$0xff]   ;;  %v1395_v63 = vld [vmem:[%s1950_s1 + $0x238] ss:$28 sps:$4 sm:$0xff]   ;;  %v1388_v6 = vld [vmem:[%s1950_s1 + $0x12c] ss:$28 sps:$4 sm:$0xff]  }
  0x16   :  { %830 = vmatprep.subr.bf16.mxu1 %v1341_v26  ;;  %v1376_v61 = vld [vmem:[%s1950_s1 + $0x19c] ss:$28 sps:$4 sm:$0xff]   ;;  %v1668_v62 = vld [vmem:[%s1951_s0] ss:$8 sps:$4 sm:$0xff]   ;;  %v1394_v10 = vld [vmem:[%s1950_s1 + $0xf4] ss:$28 sps:$4 sm:$0xff]  }
  0x17   :  { %778 = vmatpush1.bf16.msra.mxu0 %v1308_v19  ;;  %v1396_v0 = vld [vmem:[%s1950_s1 + $0x204] ss:$28 sps:$4 sm:$0xff]   ;;  %v1374_v1 = vld [vmem:[%s1950_s1 + $0x198] ss:$28 sps:$4 sm:$0xff]   ;;  %v1392_v14 = vld [vmem:[%s1950_s1 + $0xf0] ss:$28 sps:$4 sm:$0xff]  }
  0x18   :  { %779 = vmatprep.subr.bf16.mxu0 %v1309_v20  ;;  %v1382_v2 = vld [vmem:[%s1950_s1 + $0x164] ss:$28 sps:$4 sm:$0xff]   ;;  %v1713_v12 = vld [vmem:[%s1951_s0 + $0x14] ss:$8 sps:$4 sm:$0xff]   ;;  %v1732_v17 = vld [vmem:[%s1951_s0 + $0x10] ss:$8 sps:$4 sm:$0xff]  }
  0x19   :  { %831 = vmatpush1.bf16.msra.mxu1 %v1344_v29  ;;  %v1401_v3 = vld [vmem:[%s1950_s1 + $0x200] ss:$28 sps:$4 sm:$0xff]   ;;  %v1407_v7 = vld [vmem:[%s1950_s1 + $0x1c8] ss:$28 sps:$4 sm:$0xff]   ;;  %v1421_v18 = vld [vmem:[%s1950_s1 + $0x2f0] ss:$28 sps:$4 sm:$0xff]  }
  0x1a   :  { %832 = vmatprep.subr.bf16.mxu1 %v1347_v30  ;;  %v1380_v5 = vld [vmem:[%s1950_s1 + $0x160] ss:$28 sps:$4 sm:$0xff]   ;;  %v1386_v8 = vld [vmem:[%s1950_s1 + $0x128] ss:$28 sps:$4 sm:$0xff]   ;;  %v1398_v19 = vld [vmem:[%s1950_s1 + $0xb8] ss:$28 sps:$4 sm:$0xff]  }
  0x1b   :  { %780 = vmatpush1.bf16.msra.mxu0 %v1313_v23  ;;  %v1411_v9 = vld [vmem:[%s1950_s1 + $0x360] ss:$28 sps:$4 sm:$0xff]   ;;  %v1416_v13 = vld [vmem:[%s1950_s1 + $0x328] ss:$28 sps:$4 sm:$0xff]   ;;  %v1422_v21 = vld [vmem:[%s1950_s1 + $0x130] ss:$28 sps:$4 sm:$0xff]  }
  0x1c   :  { %781 = vmatprep.subr.bf16.mxu0 %v1315_v24  ;;  %v1412_v11 = vld [vmem:[%s1950_s1 + $0x1a0] ss:$28 sps:$4 sm:$0xff]   ;;  %v1417_v16 = vld [vmem:[%s1950_s1 + $0x168] ss:$28 sps:$4 sm:$0xff]   ;;  %v1426_v22 = vld [vmem:[%s1950_s1 + $0x2b8] ss:$28 sps:$4 sm:$0xff]  }
  0x1d   :  { %833 = vmatpush1.bf16.msra.mxu1 %v1350_v33  ;;  %v1400_v15 = vld [vmem:[%s1950_s1 + $0xbc] ss:$28 sps:$4 sm:$0xff]   ;;  %v1406_v20 = vld [vmem:[%s1950_s1 + $0x84] ss:$28 sps:$4 sm:$0xff]   ;;  %v149_v25 = vld [vmem:[%s1952_s2 + $0x10] sm:$0xff] }
  0x1e   :  { %834 = vmatprep.subr.bf16.mxu1 %v1353_v34  ;;  %v1404_v23 = vld [vmem:[%s1950_s1 + $0x80] ss:$28 sps:$4 sm:$0xff]   ;;  %v1410_v26 = vld [vmem:[%s1950_s1 + $0x4c] ss:$28 sps:$4 sm:$0xff]   ;;  %163 = vperm.xlu1 %1290, %v149_v25  }
  0x1f   :  { %782 = vmatpush1.bf16.msra.mxu0 %v1319_v27  ;;  %v147_v24 = vld [vmem:[%s1952_s2] sm:$0xff]  ;;  %v1427_v27 = vld [vmem:[%s1950_s1 + $0xf8] ss:$28 sps:$4 sm:$0xff]   ;;  %v148_v30 = vld [vmem:[%s1952_s2 + $0x8] sm:$0xff] }
  0x20   :  { %783 = vmatprep.subr.bf16.mxu0 %v1321_v28  ;;  %v1431_v28 = vld [vmem:[%s1950_s1 + $0x280] ss:$28 sps:$4 sm:$0xff]   ;;  %153 = vperm.xlu0 %1289, %v147_v24   ;;  %v1408_v29 = vld [vmem:[%s1950_s1 + $0x48] ss:$28 sps:$4 sm:$0xff]  }
  0x21   :  { %835 = vmatpush1.bf16.msra.mxu1 %v1356_v38  ;;  %v1432_v33 = vld [vmem:[%s1950_s1 + $0xc0] ss:$28 sps:$4 sm:$0xff]   ;;  %v1436_v34 = vld [vmem:[%s1950_s1 + $0x248] ss:$28 sps:$4 sm:$0xff]   ;;  %v1444_v38 = vld [vmem:[%s1950_s1 + $0x210] ss:$28 sps:$4 sm:$0xff]  }
  0x22   :  { %836 = vmatprep.subr.bf16.mxu1 %v1359_v39  ;;  %v1418_v39 = vld [vmem:[%s1950_s1 + $0x358] ss:$28 sps:$4 sm:$0xff]  }
  0x23   :  { %784 = vmatpush2.bf16.msra.mxu0 %v1325_v31  ;;  %v150_v31 = vld [vmem:[%s1952_s2 + $0x18] sm:$0xff] }
  0x24   :  { %785 = vmatprep.subr.bf16.mxu0 %v1327_v32  ;;  %v1415_v32 = vld [vmem:[%s1950_s1 + $0x14] ss:$28 sps:$4 sm:$0xff]   ;;  %158 = vperm.xlu0 %1289, %v148_v30  }
  0x25   :  { %837 = vmatpush2.bf16.msra.mxu1 %v1362_v42  ;;  %168 = vperm.xlu1 %1290, %v150_v31   ;;  %v1449_v42 = vld [vmem:[%s1950_s1 + $0x1d8] ss:$28 sps:$4 sm:$0xff]  }
  0x26   :  { %838 = vmatprep.subr.bf16.mxu1 %v1365_v43  ;;  %v1423_v43 = vld [vmem:[%s1950_s1 + $0x320] ss:$28 sps:$4 sm:$0xff]  }
  0x27   :  { %786 = vmatpush2.bf16.msra.mxu0 %v1331_v35  ;;  %v1413_v35 = vld [vmem:[%s1950_s1 + $0x10] ss:$28 sps:$4 sm:$0xff]  }
  0x28   :  { %787 = vmatprep.subr.bf16.mxu0 %v1333_v36  ;;  %v1420_v36 = vld [vmem:[%s1950_s1 + $0x35c] ss:$28 sps:$4 sm:$0xff]  }
  0x29   :  { %839 = vmatpush2.bf16.msra.mxu1 %v1368_v46  ;;  %v1428_v46 = vld [vmem:[%s1950_s1 + $0x2e8] ss:$28 sps:$4 sm:$0xff]  }
  0x2a   :  { %840 = vmatprep.subr.bf16.mxu1 %v1372_v47  ;;  %v1435_v47 = vld [vmem:[%s1950_s1 + $0x2b4] ss:$28 sps:$4 sm:$0xff]  }
  0x2b   :  { %788 = vmatpush2.bf16.msra.mxu0 %v1337_v40  ;;  %v1425_v40 = vld [vmem:[%s1950_s1 + $0x324] ss:$28 sps:$4 sm:$0xff]  }
  0x2c   :  { %789 = vmatprep.subr.bf16.mxu0 %v1339_v41  ;;  %v1445_v41 = vld [vmem:[%s1950_s1 + $0x50] ss:$28 sps:$4 sm:$0xff]  }
  0x2d   :  { %841 = vmatpush2.bf16.msra.mxu1 %v1377_v50  ;;  %v1441_v50 = vld [vmem:[%s1950_s1 + $0x278] ss:$28 sps:$4 sm:$0xff]  }
  0x2e   :  { %842 = vmatprep.subr.bf16.mxu1 %v1378_v51  ;;  %v1448_v51 = vld [vmem:[%s1950_s1 + $0x244] ss:$28 sps:$4 sm:$0xff]  }
  0x2f   :  { %790 = vmatpush2.bf16.msra.mxu0 %v1343_v44  ;;  %v1430_v44 = vld [vmem:[%s1950_s1 + $0x2ec] ss:$28 sps:$4 sm:$0xff]  }
  0x30   :  { %791 = vmatprep.subr.bf16.mxu0 %v1345_v45  ;;  %v1450_v45 = vld [vmem:[%s1950_s1 + $0x18] ss:$28 sps:$4 sm:$0xff]  }
  0x31   :  { %843 = vmatpush2.bf16.msra.mxu1 %v1383_v54  ;;  %v1451_v54 = vld [vmem:[%s1950_s1 + $0x208] ss:$28 sps:$4 sm:$0xff]  }
  0x32   :  { %844 = vmatprep.subr.bf16.mxu1 %v1384_v55  ;;  %v1456_v55 = vld [vmem:[%s1950_s1 + $0x1d4] ss:$28 sps:$4 sm:$0xff]  }
  0x33   :  { %792 = vmatpush2.bf16.msra.mxu0 %v1349_v48  ;;  %v1433_v48 = vld [vmem:[%s1950_s1 + $0x2b0] ss:$28 sps:$4 sm:$0xff]  }
  0x34   :  { %793 = vmatprep.subr.bf16.mxu0 %v1351_v49  ;;  %v1443_v49 = vld [vmem:[%s1950_s1 + $0x27c] ss:$28 sps:$4 sm:$0xff]  }
  0x35   :  { %845 = vmatpush2.bf16.msra.mxu1 %v1389_v58 }
  0x36   :  { %846 = vmatprep.subr.bf16.mxu1 %v1390_v59 }
  0x37   :  { %794 = vmatpush2.bf16.msra.mxu0 %v1355_v52  ;;  %v1446_v52 = vld [vmem:[%s1950_s1 + $0x240] ss:$28 sps:$4 sm:$0xff]  }
  0x38   :  { %795 = vmatprep.subr.bf16.mxu0 %v1357_v53  ;;  %v1453_v53 = vld [vmem:[%s1950_s1 + $0x20c] ss:$28 sps:$4 sm:$0xff]  }
  0x39   :  { %847 = vmatpush2.bf16.msra.mxu1 %v1395_v63 }
  0x3a   :  { %848 = vmatprep.subr.bf16.mxu1 %v1396_v0 }
  0x3b   :  { %796 = vmatpush2.bf16.msra.mxu0 %v1361_v56  ;;  %v1454_v56 = vld [vmem:[%s1950_s1 + $0x1d0] ss:$28 sps:$4 sm:$0xff]  }
  0x3c   :  { %797 = vmatprep.subr.bf16.mxu0 %v1363_v57 }
  0x3d   :  { %849 = vmatpush2.bf16.msra.mxu1 %v1401_v3 }
  0x3e   :  { %850 = vmatprep.subr.bf16.mxu1 %v1402_v4 }
  0x3f   :  { %798 = vmatpush2.bf16.msra.mxu0 %v1367_v60 }
  0x40   :  { %873 = vmatprep.subr.bf16.mxu0 %v1376_v61 }
  0x41   :  { %851 = vmatpush2.bf16.msra.mxu1 %v1407_v7 }
  0x42   :  { %800 = vmatmul.mubr.bf16.vlgmr.msra.gmra.mxu0 %v1668_v62  ;;  %1260 = vmatprep.subr.bf16.mxu1 %v1411_v9 }
  0x43   :  { %874 = vmatpush1.bf16.msra.mxu0 %v1374_v1  ;;  %809 = vmatprep.mubr.bf16.mxu0 %v1713_v12 }
  0x44   :  { %875 = vmatprep.subr.bf16.mxu0 %v1382_v2  ;;  %853 = vmatmul.mubr.bf16.vlgmr.msra.gmra.mxu1 %v1668_v62 }
  0x45   :  { %1261 = vmatpush3.bf16.msra.mxu1 %v1412_v11  ;;  %862 = vmatprep.mubr.bf16.mxu1 %v1713_v12 }
  0x46   :  { %1262 = vmatprep.subr.bf16.mxu1 %v1416_v13 }
  0x47   :  { %876 = vmatpush1.bf16.msra.mxu0 %v1380_v5 }
  0x48   :  { %877 = vmatprep.subr.bf16.mxu0 %v1388_v6 }
  0x49   :  { %1263 = vmatpush3.bf16.msra.mxu1 %v1417_v16 }
  0x4a   :  { %810 = vmatmul.mubr.bf16.gmra.mxu0 %v1732_v17  ;;  %1264 = vmatprep.subr.bf16.mxu1 %v1421_v18 }
  0x4b   :  { %878 = vmatpush1.bf16.msra.mxu0 %v1386_v8  ;;  %905 = vmatprep.mubr.bf16.mxu0 %v1589_v37 }
  0x4c   :  { %879 = vmatprep.subr.bf16.mxu0 %v1394_v10  ;;  %863 = vmatmul.mubr.bf16.gmra.mxu1 %v1732_v17 }
  0x4d   :  { %1265 = vmatpush3.bf16.msra.mxu1 %v1422_v21  ;;  %958 = vmatprep.mubr.bf16.mxu1 %v1589_v37  ;;  %v1437_v37 = vld [vmem:[%s1950_s1 + $0x88] ss:$28 sps:$4 sm:$0xff]  }
  0x4e   :  { %1266 = vmatprep.subr.bf16.mxu1 %v1426_v22 }
  0x4f   :  { %880 = vmatpush1.bf16.msra.mxu0 %v1392_v14 }
  0x50   :  { %881 = vmatprep.subr.bf16.mxu0 %v1400_v15 }
  0x51   :  { %1267 = vmatpush3.bf16.msra.mxu1 %v1427_v27 }
  0x52   :  { %1268 = vmatprep.subr.bf16.mxu1 %v1431_v28 }
  0x53   :  { %882 = vmatpush1.bf16.msra.mxu0 %v1398_v19 }
  0x54   :  { %883 = vmatprep.subr.bf16.mxu0 %v1406_v20 }
  0x55   :  { %1269 = vmatpush3.bf16.msra.mxu1 %v1432_v33 }
  0x56   :  { %1270 = vmatprep.subr.bf16.mxu1 %v1436_v34 }
  0x57   :  { %884 = vmatpush1.bf16.msra.mxu0 %v1404_v23 }
  0x58   :  { %885 = vmatprep.subr.bf16.mxu0 %v1410_v26 }
  0x59   :  { %1271 = vmatpush3.bf16.msra.mxu1 %v1437_v37 }
  0x5a   :  { %1272 = vmatprep.subr.bf16.mxu1 %v1444_v38 }
  0x5b   :  { %886 = vmatpush1.bf16.msra.mxu0 %v1408_v29 }
  0x5c   :  { %887 = vmatprep.subr.bf16.mxu0 %v1415_v32 }
  0x5d   :  { %1273 = vmatpush3.bf16.msra.mxu1 %v1445_v41 }
  0x5e   :  { %1274 = vmatprep.subr.bf16.mxu1 %v1449_v42 }
  0x5f   :  { %888 = vmatpush1.bf16.msra.mxu0 %v1413_v35 }
  0x60   :  { %889 = vmatprep.subr.bf16.mxu0 %v1420_v36 }
  0x61   :  { %1275 = vmatpush3.bf16.msra.mxu1 %v1450_v45 }
  0x63   :  { %890 = vmatpush2.bf16.msra.mxu0 %v1418_v39 }
  0x64   :  { %891 = vmatprep.subr.bf16.mxu0 %v1425_v40  ;;  %959 = vmatmul.mubr.bf16.vlgmr.msra.gmra.mxu1 %v1668_v62 }
  0x65   :  { %966 = vmatprep.mubr.bf16.mxu1 %v1713_v12 }
  0x67   :  { %892 = vmatpush2.bf16.msra.mxu0 %v1423_v43 }
  0x68   :  { %893 = vmatprep.subr.bf16.mxu0 %v1430_v44 }
  0x6b   :  { %894 = vmatpush2.bf16.msra.mxu0 %v1428_v46 }
  0x6c   :  { %895 = vmatprep.subr.bf16.mxu0 %v1435_v47  ;;  %967 = vmatmul.mubr.bf16.gmra.mxu1 %v1732_v17 }
  0x6f   :  { %896 = vmatpush2.bf16.msra.mxu0 %v1433_v48 }
  0x70   :  { %897 = vmatprep.subr.bf16.mxu0 %v1443_v49 }
  0x73   :  { %898 = vmatpush2.bf16.msra.mxu0 %v1441_v50 }
  0x74   :  { %899 = vmatprep.subr.bf16.mxu0 %v1448_v51 }
  0x77   :  { %900 = vmatpush2.bf16.msra.mxu0 %v1446_v52 }
  0x78   :  { %901 = vmatprep.subr.bf16.mxu0 %v1453_v53 }
  0x7b   :  { %902 = vmatpush2.bf16.msra.mxu0 %v1451_v54 }
  0x7c   :  { %903 = vmatprep.subr.bf16.mxu0 %v1456_v55 }
  0x7f   :  { %904 = vmatpush2.bf16.msra.mxu0 %v1454_v56 }
  0x82   :  { %906 = vmatmul.mubr.bf16.vlgmr.msra.gmra.mxu0 %v1668_v62 }
  0x83   :  { %915 = vmatprep.mubr.bf16.mxu0 %v1713_v12 }
  0x8a   :  { %916 = vmatmul.mubr.bf16.gmra.mxu0 %v1732_v17 }
  0x99   :  { %v1874_v10 = vpop.permute.xlu1 %163 }
  0x9b   :  { %v1862_v57 = vpop.permute.xlu0 %153 }
  0x9f   :  { %v1865_v61 = vpop.permute.xlu0 %158 }
  0xa0   :  { %v1884_v27 = vpop.permute.xlu1 %168 }
 0x102   :  { %v801_v58 = vpop.f32.mrf.mxu0 }
 0x103   :  { %v802_v59 = vadd.f32 %v801_v58, %v1862_v57 }
 0x104   :  { %v803_v60 = vpop.f32.mrf.mxu0  ;;  %v854_v8 = vpop.f32.mrf.mxu1 }
 0x105   :  { %v975_v63 = vmax.f32 %v802_v59, 0.0  ;;  %v804_v0 = vadd.f32 %v803_v60, %v1862_v57  ;;  %v855_v9 = vadd.f32 %v854_v8, %v1862_v57 }
 0x106   :  { %v805_v1 = vpop.f32.mrf.mxu0  ;;  %v856_v12 = vpop.f32.mrf.mxu1 }
 0x107   :  { %v976_v2 = vmax.f32 %v804_v0, 0.0  ;;  %v806_v3 = vadd.f32 %v805_v1, %v1865_v61  ;;  %v977_v13 = vmax.f32 %v855_v9, 0.0  ;;  %v857_v14 = vadd.f32 %v856_v12, %v1862_v57 }
 0x108   :  { %v807_v62 = vpop.f32.mrf.mxu0  ;;  %v858_v16 = vpop.f32.mrf.mxu1 }
 0x109   :  { %v1244_v4 = vpack.c.bf16 %v976_v2, %v975_v63  ;;  %v808_v5 = vadd.f32 %v807_v62, %v1865_v61  ;;  %v982_v6 = vmax.f32 %v806_v3, 0.0  ;;  %v978_v18 = vmax.f32 %v857_v14, 0.0 }
 0x10a   :  { %v811_v15 = vpop.f32.mrf.mxu0  ;;  %v859_v19 = vadd.f32 %v858_v16, %v1865_v61  ;;  %v860_v21 = vpop.f32.mrf.mxu1 }
 0x10b   :  { %1091 = vst [vmem:[%s1953_s3] sm:$0xff] %v1244_v4  ;;  %v983_v7 = vmax.f32 %v808_v5, 0.0  ;;  %v812_v17 = vadd.f32 %v811_v15, %v1874_v10  ;;  %v1245_v24 = vpack.c.bf16 %v978_v18, %v977_v13  ;;  %v861_v26 = vadd.f32 %v860_v21, %v1865_v61 }
 0x10c   :  { %v813_v20 = vpop.f32.mrf.mxu0  ;;  %v984_v25 = vmax.f32 %v859_v19, 0.0  ;;  %v864_v29 = vpop.f32.mrf.mxu1 }
 0x10d   :  { %v1248_v11 = vpack.c.bf16 %v983_v7, %v982_v6  ;;  %v989_v22 = vmax.f32 %v812_v17, 0.0  ;;  %v814_v23 = vadd.f32 %v813_v20, %v1874_v10  ;;  %1092 = vst [vmem:[%s1953_s3 + $0x8] sm:$0xff] %v1245_v24  ;;  %v985_v32 = vmax.f32 %v861_v26, 0.0 }
 0x10e   :  { %v815_v28 = vpop.f32.mrf.mxu0  ;;  %v865_v33 = vadd.f32 %v864_v29, %v1874_v10  ;;  %v866_v35 = vpop.f32.mrf.mxu1 }
 0x10f   :  { %1096 = vst [vmem:[%s1953_s3 + $0x1c] sm:$0xff] %v1248_v11  ;;  %v990_v30 = vmax.f32 %v814_v23, 0.0  ;;  %v816_v31 = vadd.f32 %v815_v28, %v1884_v27  ;;  %v1249_v39 = vpack.c.bf16 %v985_v32, %v984_v25  ;;  %v867_v40 = vadd.f32 %v866_v35, %v1874_v10 }
 0x110   :  { %v817_v34 = vpop.f32.mrf.mxu0  ;;  %v991_v41 = vmax.f32 %v865_v33, 0.0  ;;  %v868_v42 = vpop.f32.mrf.mxu1 }
 0x111   :  { %v1252_v36 = vpack.c.bf16 %v990_v30, %v989_v22  ;;  %v996_v37 = vmax.f32 %v816_v31, 0.0  ;;  %v818_v38 = vadd.f32 %v817_v34, %v1884_v27  ;;  %1097 = vst [vmem:[%s1953_s3 + $0x24] sm:$0xff] %v1249_v39  ;;  %v992_v44 = vmax.f32 %v867_v40, 0.0 }
 0x112   :  { %v869_v45 = vadd.f32 %v868_v42, %v1884_v27  ;;  %v870_v46 = vpop.f32.mrf.mxu1 }
 0x113   :  { %1100 = vst [vmem:[%s1953_s3 + $0x38] sm:$0xff] %v1252_v36  ;;  %v997_v43 = vmax.f32 %v818_v38, 0.0  ;;  %v1253_v48 = vpack.c.bf16 %v992_v44, %v991_v41  ;;  %v871_v49 = vadd.f32 %v870_v46, %v1884_v27 }
 0x114   :  { %v998_v50 = vmax.f32 %v869_v45, 0.0 }
 0x115   :  { %v1256_v47 = vpack.c.bf16 %v997_v43, %v996_v37  ;;  %1101 = vst [vmem:[%s1953_s3 + $0x40] sm:$0xff] %v1253_v48  ;;  %v999_v51 = vmax.f32 %v871_v49, 0.0 }
 0x117   :  { %1104 = vst [vmem:[%s1953_s3 + $0x54] sm:$0xff] %v1256_v47  ;;  %v1257_v52 = vpack.c.bf16 %v999_v51, %v998_v50 }
 0x119   :  { %1105 = vst [vmem:[%s1953_s3 + $0x5c] sm:$0xff] %v1257_v52 }
 0x124   :  { %v1276_v53 = vpop.f32.mrf.mxu1 }
 0x126   :  { %v1277_v54 = vpop.f32.mrf.mxu1 }
 0x127   :  { %v1278_v55 = vadd.f32 %v1277_v54, %v1276_v53 }
 0x128   :  { %v1279_v56 = vpop.f32.mrf.mxu1 }
 0x129   :  { %v961_v58 = vadd.f32 %v1278_v55, %v1862_v57 }
 0x12a   :  { %v1280_v59 = vpop.f32.mrf.mxu1 }
 0x12b   :  { %v981_v60 = vmax.f32 %v961_v58, 0.0  ;;  %v1281_v63 = vadd.f32 %v1280_v59, %v1279_v56 }
 0x12c   :  { %v1282_v0 = vpop.f32.mrf.mxu1 }
 0x12d   :  { %v1247_v1 = vpack.c.bf16 %v981_v60, %v981_v60  ;;  %v964_v2 = vadd.f32 %v1281_v63, %v1865_v61 }
 0x12e   :  { %v1283_v3 = vpop.f32.mrf.mxu1 }
 0x12f   :  { %1095 = vst.msk [vmem:[%s1953_s3 + $0x18] sm:$0xf] %vm1094_vm0, %v1247_v1  ;;  %v988_v62 = vmax.f32 %v964_v2, 0.0  ;;  %v1284_v4 = vadd.f32 %v1283_v3, %v1282_v0 }
 0x130   :  { %v1285_v5 = vpop.f32.mrf.mxu1 }
 0x131   :  { %v1251_v6 = vpack.c.bf16 %v988_v62, %v988_v62  ;;  %v969_v7 = vadd.f32 %v1284_v4, %v1874_v10 }
 0x132   :  { %v1286_v8 = vpop.f32.mrf.mxu1 }
 0x133   :  { %1099 = vst.msk [vmem:[%s1953_s3 + $0x34] sm:$0xf] %vm1094_vm0, %v1251_v6  ;;  %v995_v9 = vmax.f32 %v969_v7, 0.0  ;;  %v1287_v11 = vadd.f32 %v1286_v8, %v1285_v5 }
 0x135   :  { %v1255_v12 = vpack.c.bf16 %v995_v9, %v995_v9  ;;  %v972_v13 = vadd.f32 %v1287_v11, %v1884_v27 }
 0x137   :  { %1103 = vst.msk [vmem:[%s1953_s3 + $0x50] sm:$0xf] %vm1094_vm0, %v1255_v12  ;;  %v1002_v14 = vmax.f32 %v972_v13, 0.0 }
 0x139   :  { %v1259_v15 = vpack.c.bf16 %v1002_v14, %v1002_v14 }
 0x13b   :  { %1107 = vst.msk [vmem:[%s1953_s3 + $0x6c] sm:$0xf] %vm1094_vm0, %v1259_v15 }
 0x142   :  { %v907_v16 = vpop.f32.mrf.mxu0 }
 0x143   :  { %v908_v17 = vadd.f32 %v907_v16, %v1862_v57 }
 0x144   :  { %v909_v18 = vpop.f32.mrf.mxu0 }
 0x145   :  { %v910_v19 = vadd.f32 %v909_v18, %v1862_v57  ;;  %v979_v21 = vmax.f32 %v908_v17, 0.0 }
 0x146   :  { %v911_v20 = vpop.f32.mrf.mxu0 }
 0x147   :  { %v980_v22 = vmax.f32 %v910_v19, 0.0  ;;  %v912_v23 = vadd.f32 %v911_v20, %v1865_v61 }
 0x148   :  { %v913_v24 = vpop.f32.mrf.mxu0 }
 0x149   :  { %v1246_v25 = vpack.c.bf16 %v980_v22, %v979_v21  ;;  %v914_v26 = vadd.f32 %v913_v24, %v1865_v61  ;;  %v986_v29 = vmax.f32 %v912_v23, 0.0 }
 0x14a   :  { %v917_v28 = vpop.f32.mrf.mxu0 }
 0x14b   :  { %1093 = vst [vmem:[%s1953_s3 + $0x10] sm:$0xff] %v1246_v25  ;;  %v987_v30 = vmax.f32 %v914_v26, 0.0  ;;  %v918_v31 = vadd.f32 %v917_v28, %v1874_v10 }
 0x14c   :  { %v919_v32 = vpop.f32.mrf.mxu0 }
 0x14d   :  { %v1250_v57 = vpack.c.bf16 %v987_v30, %v986_v29  ;;  %v920_v33 = vadd.f32 %v919_v32, %v1874_v10  ;;  %v993_v35 = vmax.f32 %v918_v31, 0.0 }
 0x14e   :  { %v921_v34 = vpop.f32.mrf.mxu0 }
 0x14f   :  { %1098 = vst [vmem:[%s1953_s3 + $0x2c] sm:$0xff] %v1250_v57  ;;  %v994_v61 = vmax.f32 %v920_v33, 0.0  ;;  %v922_v36 = vadd.f32 %v921_v34, %v1884_v27 }
 0x150   :  { %v923_v37 = vpop.f32.mrf.mxu0 }
 0x151   :  { %v1254_v38 = vpack.c.bf16 %v994_v61, %v993_v35  ;;  %v924_v39 = vadd.f32 %v923_v37, %v1884_v27  ;;  %v1000_v40 = vmax.f32 %v922_v36, 0.0 }
 0x153   :  { %1102 = vst [vmem:[%s1953_s3 + $0x48] sm:$0xff] %v1254_v38  ;;  %v1001_v41 = vmax.f32 %v924_v39, 0.0 }
 0x155   :  { %v1258_v10 = vpack.c.bf16 %v1001_v41, %v1000_v40 }
 0x157   :  { %1106 = vst [vmem:[%s1953_s3 + $0x64] sm:$0xff] %v1258_v10 }

// kernel: dqn_forward.5
= control target key start
LH: loop header
LB: loop body
LE: loop exit
PB: predicated region body
PF: predicated region fallthrough
CT: control target
= control target key end

     0   :  { %v986_v1 = vmov 0   ;;  %vm752_vm0 = vcmask 1043456   ;;  %vm753_vm1 = vcmask 277508   ;;  %s1315_s1 = inlined_call_operand.vmem [shape: bf16[512,162], index: 1, kind: input, shape index: {}]   ;;  %s1316_s0 = inlined_call_operand.vmem [shape: bf16[64,512], index: 0, kind: input, shape index: {}]   ;;  %s1317_s2 = inlined_call_operand.vmem [shape: f32[64,1], index: 2, kind: input, shape index: {}]   ;;  %s1318_s3 = inlined_call_operand.vmem [shape: bf16[64,162], index: 3, kind: output, shape index: {}]  }
   0x1   :  { %v866_v0 = vld [vmem:[%s1315_s1 + $0x74] ss:$8 sps:$4 sm:$0xff]   ;;  %864 = vset.pattern.permute.xlu0 %v986_v1  ;;  %865 = vset.pattern.permute.xlu1 %v986_v1  ;;  %v870_v3 = vld [vmem:[%s1315_s1 + $0x70] ss:$8 sps:$4 sm:$0xff]   ;;  %v872_v5 = vld [vmem:[%s1315_s1 + $0x64] ss:$8 sps:$4 sm:$0xff]  }
   0x2   :  { %v868_v2 = vld [vmem:[%s1315_s1 + $0x174] ss:$8 sps:$4 sm:$0xff]   ;;  %542 = vmatprep.subr.bf16.mxu0 %v866_v0  ;;  %v871_v4 = vld [vmem:[%s1315_s1 + $0x170] ss:$8 sps:$4 sm:$0xff]   ;;  %v874_v6 = vld [vmem:[%s1315_s1 + $0x164] ss:$8 sps:$4 sm:$0xff]  }
   0x3   :  { %615 = vmatprep.subr.bf16.mxu1 %v868_v2  ;;  %543 = vmatpush1.bf16.msra.mxu0 %v870_v3  ;;  %v876_v7 = vld [vmem:[%s1315_s1 + $0x60] ss:$8 sps:$4 sm:$0xff]   ;;  %v878_v9 = vld [vmem:[%s1315_s1 + $0x54] ss:$8 sps:$4 sm:$0xff]   ;;  %v882_v11 = vld [vmem:[%s1315_s1 + $0x50] ss:$8 sps:$4 sm:$0xff]  }
   0x4   :  { %616 = vmatpush1.bf16.msra.mxu1 %v871_v4  ;;  %544 = vmatprep.subr.bf16.mxu0 %v872_v5  ;;  %v877_v8 = vld [vmem:[%s1315_s1 + $0x160] ss:$8 sps:$4 sm:$0xff]   ;;  %v880_v10 = vld [vmem:[%s1315_s1 + $0x154] ss:$8 sps:$4 sm:$0xff]   ;;  %v883_v12 = vld [vmem:[%s1315_s1 + $0x150] ss:$8 sps:$4 sm:$0xff]  }
   0x5   :  { %617 = vmatprep.subr.bf16.mxu1 %v874_v6  ;;  %v884_v13 = vld [vmem:[%s1315_s1 + $0x44] ss:$8 sps:$4 sm:$0xff]   ;;  %v888_v15 = vld [vmem:[%s1315_s1 + $0x40] ss:$8 sps:$4 sm:$0xff]   ;;  %v890_v17 = vld [vmem:[%s1315_s1 + $0x34] ss:$8 sps:$4 sm:$0xff]  }
   0x6   :  { %v886_v14 = vld [vmem:[%s1315_s1 + $0x144] ss:$8 sps:$4 sm:$0xff]   ;;  %v889_v16 = vld [vmem:[%s1315_s1 + $0x140] ss:$8 sps:$4 sm:$0xff]   ;;  %v892_v18 = vld [vmem:[%s1315_s1 + $0x134] ss:$8 sps:$4 sm:$0xff]  }
   0x7   :  { %545 = vmatpush1.bf16.msra.mxu0 %v876_v7  ;;  %v894_v19 = vld [vmem:[%s1315_s1 + $0x30] ss:$8 sps:$4 sm:$0xff]   ;;  %v896_v21 = vld [vmem:[%s1315_s1 + $0x24] ss:$8 sps:$4 sm:$0xff]   ;;  %v900_v23 = vld [vmem:[%s1315_s1 + $0x20] ss:$8 sps:$4 sm:$0xff]  }
   0x8   :  { %618 = vmatpush1.bf16.msra.mxu1 %v877_v8  ;;  %546 = vmatprep.subr.bf16.mxu0 %v878_v9  ;;  %v895_v20 = vld [vmem:[%s1315_s1 + $0x130] ss:$8 sps:$4 sm:$0xff]   ;;  %v898_v22 = vld [vmem:[%s1315_s1 + $0x124] ss:$8 sps:$4 sm:$0xff]   ;;  %v901_v24 = vld [vmem:[%s1315_s1 + $0x120] ss:$8 sps:$4 sm:$0xff]  }
   0x9   :  { %619 = vmatprep.subr.bf16.mxu1 %v880_v10  ;;  %v902_v25 = vld [vmem:[%s1315_s1 + $0x14] ss:$8 sps:$4 sm:$0xff]   ;;  %v906_v27 = vld [vmem:[%s1315_s1 + $0x10] ss:$8 sps:$4 sm:$0xff]   ;;  %v908_v29 = vld [vmem:[%s1315_s1 + $0x4] ss:$8 sps:$4 sm:$0xff]  }
   0xa   :  { %v904_v26 = vld [vmem:[%s1315_s1 + $0x114] ss:$8 sps:$4 sm:$0xff]   ;;  %v907_v28 = vld [vmem:[%s1315_s1 + $0x110] ss:$8 sps:$4 sm:$0xff]   ;;  %v910_v30 = vld [vmem:[%s1315_s1 + $0x104] ss:$8 sps:$4 sm:$0xff]  }
   0xb   :  { %547 = vmatpush1.bf16.msra.mxu0 %v882_v11  ;;  %v912_v31 = vld [vmem:[%s1315_s1] ss:$8 sps:$4 sm:$0xff]   ;;  %v914_v33 = vld [vmem:[%s1315_s1 + $0xf4] ss:$8 sps:$4 sm:$0xff]   ;;  %v918_v35 = vld [vmem:[%s1315_s1 + $0xf0] ss:$8 sps:$4 sm:$0xff]  }
   0xc   :  { %620 = vmatpush1.bf16.msra.mxu1 %v883_v12  ;;  %548 = vmatprep.subr.bf16.mxu0 %v884_v13  ;;  %v913_v32 = vld [vmem:[%s1315_s1 + $0x100] ss:$8 sps:$4 sm:$0xff]   ;;  %v916_v34 = vld [vmem:[%s1315_s1 + $0x1f4] ss:$8 sps:$4 sm:$0xff]   ;;  %v919_v36 = vld [vmem:[%s1315_s1 + $0x1f0] ss:$8 sps:$4 sm:$0xff]  }
   0xd   :  { %621 = vmatprep.subr.bf16.mxu1 %v886_v14  ;;  %v920_v37 = vld [vmem:[%s1315_s1 + $0xe4] ss:$8 sps:$4 sm:$0xff]   ;;  %v924_v39 = vld [vmem:[%s1315_s1 + $0xe0] ss:$8 sps:$4 sm:$0xff]   ;;  %v926_v41 = vld [vmem:[%s1315_s1 + $0xd4] ss:$8 sps:$4 sm:$0xff]  }
   0xe   :  { %v922_v38 = vld [vmem:[%s1315_s1 + $0x1e4] ss:$8 sps:$4 sm:$0xff]   ;;  %v925_v40 = vld [vmem:[%s1315_s1 + $0x1e0] ss:$8 sps:$4 sm:$0xff]   ;;  %v928_v42 = vld [vmem:[%s1315_s1 + $0x1d4] ss:$8 sps:$4 sm:$0xff]  }
   0xf   :  { %549 = vmatpush1.bf16.msra.mxu0 %v888_v15  ;;  %v930_v43 = vld [vmem:[%s1315_s1 + $0xd0] ss:$8 sps:$4 sm:$0xff]   ;;  %v932_v45 = vld [vmem:[%s1315_s1 + $0xc4] ss:$8 sps:$4 sm:$0xff]   ;;  %v936_v47 = vld [vmem:[%s1315_s1 + $0xc0] ss:$8 sps:$4 sm:$0xff]  }
  0x10   :  { %622 = vmatpush1.bf16.msra.mxu1 %v889_v16  ;;  %550 = vmatprep.subr.bf16.mxu0 %v890_v17  ;;  %v931_v44 = vld [vmem:[%s1315_s1 + $0x1d0] ss:$8 sps:$4 sm:$0xff]   ;;  %v934_v46 = vld [vmem:[%s1315_s1 + $0x1c4] ss:$8 sps:$4 sm:$0xff]   ;;  %v937_v48 = vld [vmem:[%s1315_s1 + $0x1c0] ss:$8 sps:$4 sm:$0xff]  }
  0x11   :  { %623 = vmatprep.subr.bf16.mxu1 %v892_v18  ;;  %v938_v49 = vld [vmem:[%s1315_s1 + $0xb4] ss:$8 sps:$4 sm:$0xff]   ;;  %v942_v53 = vld [vmem:[%s1315_s1 + $0xb0] ss:$8 sps:$4 sm:$0xff]   ;;  %v944_v55 = vld [vmem:[%s1315_s1 + $0xa4] ss:$8 sps:$4 sm:$0xff]  }
  0x12   :  { %v964_v50 = vld [vmem:[%s1316_s0 + $0x4] ss:$16 sps:$4 sm:$0xff]   ;;  %v967_v52 = vld [vmem:[%s1316_s0 + $0xc] ss:$16 sps:$4 sm:$0xff]   ;;  %v943_v54 = vld [vmem:[%s1315_s1 + $0x1b0] ss:$8 sps:$4 sm:$0xff]  }
  0x13   :  { %551 = vmatpush1.bf16.msra.mxu0 %v894_v19  ;;  %v940_v51 = vld [vmem:[%s1315_s1 + $0x1b4] ss:$8 sps:$4 sm:$0xff]   ;;  %574 = vmatprep.mubr.bf16.mxu0 %v964_v50  ;;  %v946_v56 = vld [vmem:[%s1315_s1 + $0x1a4] ss:$8 sps:$4 sm:$0xff]   ;;  %v948_v57 = vld [vmem:[%s1315_s1 + $0xa0] ss:$8 sps:$4 sm:$0xff]  }
  0x14   :  { %624 = vmatpush1.bf16.msra.mxu1 %v895_v20  ;;  %552 = vmatprep.subr.bf16.mxu0 %v896_v21  ;;  %v949_v58 = vld [vmem:[%s1315_s1 + $0x1a0] ss:$8 sps:$4 sm:$0xff]   ;;  %v950_v59 = vld [vmem:[%s1315_s1 + $0x94] ss:$8 sps:$4 sm:$0xff]   ;;  %v954_v0 = vld [vmem:[%s1315_s1 + $0x90] ss:$8 sps:$4 sm:$0xff]  }
  0x15   :  { %625 = vmatprep.subr.bf16.mxu1 %v898_v22  ;;  %647 = vmatprep.mubr.bf16.mxu1 %v967_v52  ;;  %v952_v60 = vld [vmem:[%s1315_s1 + $0x194] ss:$8 sps:$4 sm:$0xff]   ;;  %v94_v61 = vld [vmem:[%s1317_s2] sm:$0xff]  ;;  %v95_v63 = vld [vmem:[%s1317_s2 + $0x8] sm:$0xff] }
  0x16   :  { %104 = vperm.xlu0 %864, %v94_v61   ;;  %v96_v62 = vld [vmem:[%s1317_s2 + $0x10] sm:$0xff]  ;;  %v97_v2 = vld [vmem:[%s1317_s2 + $0x18] sm:$0xff]  ;;  %v956_v3 = vld [vmem:[%s1315_s1 + $0x84] ss:$8 sps:$4 sm:$0xff]  }
  0x17   :  { %553 = vmatpush1.bf16.msra.mxu0 %v900_v23  ;;  %114 = vperm.xlu1 %865, %v96_v62   ;;  %v955_v1 = vld [vmem:[%s1315_s1 + $0x190] ss:$8 sps:$4 sm:$0xff]   ;;  %v958_v4 = vld [vmem:[%s1315_s1 + $0x184] ss:$8 sps:$4 sm:$0xff]   ;;  %v960_v6 = vld [vmem:[%s1315_s1 + $0x80] ss:$8 sps:$4 sm:$0xff]  }
  0x18   :  { %626 = vmatpush1.bf16.msra.mxu1 %v901_v24  ;;  %554 = vmatprep.subr.bf16.mxu0 %v902_v25  ;;  %v98_v5 = vld [vmem:[%s1317_s2 + $0x20] sm:$0xff]  ;;  %v99_v8 = vld [vmem:[%s1317_s2 + $0x28] sm:$0xff]  ;;  %v100_v11 = vld [vmem:[%s1317_s2 + $0x30] sm:$0xff] }
  0x19   :  { %627 = vmatprep.subr.bf16.mxu1 %v904_v26  ;;  %v961_v7 = vld [vmem:[%s1315_s1 + $0x180] ss:$8 sps:$4 sm:$0xff]   ;;  %v968_v12 = vld [vmem:[%s1316_s0 + $0x24] ss:$16 sps:$4 sm:$0xff]   ;;  %v970_v13 = vld [vmem:[%s1316_s0 + $0x2c] ss:$16 sps:$4 sm:$0xff]  }
  0x1a   :  { %109 = vperm.xlu0 %864, %v95_v63   ;;  %v962_v9 = vld [vmem:[%s1316_s0] ss:$16 sps:$4 sm:$0xff]   ;;  %v965_v10 = vld [vmem:[%s1316_s0 + $0x8] ss:$16 sps:$4 sm:$0xff]   ;;  %v974_v17 = vld [vmem:[%s1316_s0 + $0x44] ss:$16 sps:$4 sm:$0xff]  }
  0x1b   :  { %555 = vmatpush1.bf16.msra.mxu0 %v906_v27  ;;  %119 = vperm.xlu1 %865, %v97_v2   ;;  %v101_v14 = vld [vmem:[%s1317_s2 + $0x38] sm:$0xff]  ;;  %v972_v15 = vld [vmem:[%s1316_s0 + $0x20] ss:$16 sps:$4 sm:$0xff]   ;;  %v980_v21 = vld [vmem:[%s1316_s0 + $0x64] ss:$16 sps:$4 sm:$0xff]  }
  0x1c   :  { %628 = vmatpush1.bf16.msra.mxu1 %v907_v28  ;;  %556 = vmatprep.subr.bf16.mxu0 %v908_v29  ;;  %v973_v16 = vld [vmem:[%s1316_s0 + $0x28] ss:$16 sps:$4 sm:$0xff]   ;;  %v976_v18 = vld [vmem:[%s1316_s0 + $0x4c] ss:$16 sps:$4 sm:$0xff]   ;;  %v978_v19 = vld [vmem:[%s1316_s0 + $0x40] ss:$16 sps:$4 sm:$0xff]  }
  0x1d   :  { %629 = vmatprep.subr.bf16.mxu1 %v910_v30  ;;  %v979_v20 = vld [vmem:[%s1316_s0 + $0x48] ss:$16 sps:$4 sm:$0xff]   ;;  %v982_v22 = vld [vmem:[%s1316_s0 + $0x6c] ss:$16 sps:$4 sm:$0xff]   ;;  %v984_v23 = vld [vmem:[%s1316_s0 + $0x60] ss:$16 sps:$4 sm:$0xff]  }
  0x1e   :  { %124 = vperm.xlu0 %864, %v98_v5   ;;  %v985_v24 = vld [vmem:[%s1316_s0 + $0x68] ss:$16 sps:$4 sm:$0xff]   ;;  %vm1271_vm2 = vmor %vm753_vm1, %vm752_vm0 }
  0x1f   :  { %557 = vmatpush1.bf16.msra.mxu0 %v912_v31  ;;  %129 = vperm.xlu1 %865, %v99_v8  }
  0x20   :  { %630 = vmatpush1.bf16.msra.mxu1 %v913_v32  ;;  %558 = vmatprep.subr.bf16.mxu0 %v914_v33 }
  0x21   :  { %631 = vmatprep.subr.bf16.mxu1 %v916_v34 }
  0x22   :  { %134 = vperm.xlu0 %864, %v100_v11  }
  0x23   :  { %559 = vmatpush2.bf16.msra.mxu0 %v918_v35  ;;  %139 = vperm.xlu1 %865, %v101_v14  }
  0x24   :  { %632 = vmatpush2.bf16.msra.mxu1 %v919_v36  ;;  %560 = vmatprep.subr.bf16.mxu0 %v920_v37 }
  0x25   :  { %633 = vmatprep.subr.bf16.mxu1 %v922_v38 }
  0x27   :  { %561 = vmatpush2.bf16.msra.mxu0 %v924_v39 }
  0x28   :  { %634 = vmatpush2.bf16.msra.mxu1 %v925_v40  ;;  %562 = vmatprep.subr.bf16.mxu0 %v926_v41 }
  0x29   :  { %635 = vmatprep.subr.bf16.mxu1 %v928_v42 }
  0x2b   :  { %563 = vmatpush2.bf16.msra.mxu0 %v930_v43 }
  0x2c   :  { %636 = vmatpush2.bf16.msra.mxu1 %v931_v44  ;;  %564 = vmatprep.subr.bf16.mxu0 %v932_v45 }
  0x2d   :  { %637 = vmatprep.subr.bf16.mxu1 %v934_v46 }
  0x2f   :  { %565 = vmatpush2.bf16.msra.mxu0 %v936_v47 }
  0x30   :  { %638 = vmatpush2.bf16.msra.mxu1 %v937_v48  ;;  %566 = vmatprep.subr.bf16.mxu0 %v938_v49 }
  0x31   :  { %639 = vmatprep.subr.bf16.mxu1 %v940_v51 }
  0x33   :  { %567 = vmatpush2.bf16.msra.mxu0 %v942_v53 }
  0x34   :  { %640 = vmatpush2.bf16.msra.mxu1 %v943_v54  ;;  %568 = vmatprep.subr.bf16.mxu0 %v944_v55 }
  0x35   :  { %641 = vmatprep.subr.bf16.mxu1 %v946_v56 }
  0x37   :  { %569 = vmatpush2.bf16.msra.mxu0 %v948_v57 }
  0x38   :  { %642 = vmatpush2.bf16.msra.mxu1 %v949_v58  ;;  %570 = vmatprep.subr.bf16.mxu0 %v950_v59 }
  0x39   :  { %643 = vmatprep.subr.bf16.mxu1 %v952_v60 }
  0x3b   :  { %571 = vmatpush2.bf16.msra.mxu0 %v954_v0 }
  0x3c   :  { %644 = vmatpush2.bf16.msra.mxu1 %v955_v1  ;;  %572 = vmatprep.subr.bf16.mxu0 %v956_v3 }
  0x3d   :  { %645 = vmatprep.subr.bf16.mxu1 %v958_v4 }
  0x3f   :  { %573 = vmatpush2.bf16.msra.mxu0 %v960_v6 }
  0x40   :  { %646 = vmatpush2.bf16.msra.mxu1 %v961_v7 }
  0x42   :  { %575 = vmatmul.mubr.bf16.vlgmr.msra.gmra.mxu0 %v962_v9 }
  0x43   :  { %648 = vmatmul.mubr.bf16.vlgmr.msra.gmra.mxu1 %v965_v10  ;;  %584 = vmatprep.mubr.bf16.mxu0 %v968_v12 }
  0x44   :  { %657 = vmatprep.mubr.bf16.mxu1 %v970_v13 }
  0x4a   :  { %585 = vmatmul.mubr.bf16.gmra.mxu0 %v972_v15 }
  0x4b   :  { %658 = vmatmul.mubr.bf16.gmra.mxu1 %v973_v16  ;;  %594 = vmatprep.mubr.bf16.mxu0 %v974_v17 }
  0x4c   :  { %667 = vmatprep.mubr.bf16.mxu1 %v976_v18 }
  0x52   :  { %595 = vmatmul.mubr.bf16.gmra.mxu0 %v978_v19 }
  0x53   :  { %668 = vmatmul.mubr.bf16.gmra.mxu1 %v979_v20  ;;  %604 = vmatprep.mubr.bf16.mxu0 %v980_v21 }
  0x54   :  { %677 = vmatprep.mubr.bf16.mxu1 %v982_v22 }
  0x5a   :  { %605 = vmatmul.mubr.bf16.gmra.mxu0 %v984_v23 }
  0x5b   :  { %678 = vmatmul.mubr.bf16.gmra.mxu1 %v985_v24 }
  0x91   :  { %v105_v25 = vpop.permute.xlu0 %104 }
  0x92   :  { %v115_v38 = vpop.permute.xlu1 %114 }
  0x95   :  { %v110_v29 = vpop.permute.xlu0 %109 }
  0x96   :  { %v120_v56 = vpop.permute.xlu1 %119 }
  0x99   :  { %v125_v4 = vpop.permute.xlu0 %124 }
  0x9a   :  { %v130_v14 = vpop.permute.xlu1 %129 }
 0x102   :  { %v576_v26 = vpop.f32.mrf.mxu0 }
 0x103   :  { %v649_v27 = vpop.f32.mrf.mxu1  ;;  %v577_v28 = vadd.f32 %v576_v26, %v105_v25  ;;  %v135_v26 = vpop.permute.xlu0 %134 }
 0x104   :  { %v578_v30 = vpop.f32.mrf.mxu0 }
 0x105   :  { %v651_v31 = vpop.f32.mrf.mxu1  ;;  %v650_v32 = vadd.f32 %v649_v27, %v577_v28  ;;  %v579_v33 = vadd.f32 %v578_v30, %v105_v25 }
 0x106   :  { %v580_v34 = vpop.f32.mrf.mxu0 }
 0x107   :  { %v653_v35 = vpop.f32.mrf.mxu1  ;;  %v652_v36 = vadd.f32 %v651_v31, %v579_v33  ;;  %v581_v37 = vadd.f32 %v580_v34, %v110_v29  ;;  %v688_v41 = vmax.f32 %v650_v32, 0.0 }
 0x108   :  { %v582_v39 = vpop.f32.mrf.mxu0 }
 0x109   :  { %v655_v40 = vpop.f32.mrf.mxu1  ;;  %v689_v42 = vmax.f32 %v652_v36, 0.0  ;;  %v654_v43 = vadd.f32 %v653_v35, %v581_v37  ;;  %v583_v44 = vadd.f32 %v582_v39, %v110_v29  ;;  %v140_v37 = vpop.permute.xlu1 %139 }
 0x10a   :  { %v586_v46 = vpop.f32.mrf.mxu0 }
 0x10b   :  { %v659_v47 = vpop.f32.mrf.mxu1  ;;  %v855_v48 = vpack.c.bf16 %v689_v42, %v688_v41  ;;  %v656_v49 = vadd.f32 %v655_v40, %v583_v44  ;;  %v587_v50 = vadd.f32 %v586_v46, %v115_v38  ;;  %v690_v53 = vmax.f32 %v654_v43, 0.0 }
 0x10c   :  { %v588_v51 = vpop.f32.mrf.mxu0 }
 0x10d   :  { %v661_v52 = vpop.f32.mrf.mxu1  ;;  %755 = vst.msk [vmem:[%s1318_s3] sm:$0xff] %vm1271_vm2, %v855_v48  ;;  %v691_v54 = vmax.f32 %v656_v49, 0.0  ;;  %v660_v55 = vadd.f32 %v659_v47, %v587_v50  ;;  %v589_v57 = vadd.f32 %v588_v51, %v115_v38 }
 0x10e   :  { %v590_v58 = vpop.f32.mrf.mxu0 }
 0x10f   :  { %v663_v59 = vpop.f32.mrf.mxu1  ;;  %v856_v60 = vpack.c.bf16 %v691_v54, %v690_v53  ;;  %v662_v61 = vadd.f32 %v661_v52, %v589_v57  ;;  %v591_v62 = vadd.f32 %v590_v58, %v120_v56  ;;  %v692_v1 = vmax.f32 %v660_v55, 0.0 }
 0x110   :  { %v592_v63 = vpop.f32.mrf.mxu0 }
 0x111   :  { %v665_v0 = vpop.f32.mrf.mxu1  ;;  %756 = vst.msk [vmem:[%s1318_s3 + $0x8] sm:$0xff] %vm1271_vm2, %v856_v60  ;;  %v693_v2 = vmax.f32 %v662_v61, 0.0  ;;  %v664_v3 = vadd.f32 %v663_v59, %v591_v62  ;;  %v593_v5 = vadd.f32 %v592_v63, %v120_v56 }
 0x112   :  { %v596_v6 = vpop.f32.mrf.mxu0 }
 0x113   :  { %v669_v7 = vpop.f32.mrf.mxu1  ;;  %v857_v8 = vpack.c.bf16 %v693_v2, %v692_v1  ;;  %v666_v9 = vadd.f32 %v665_v0, %v593_v5  ;;  %v597_v10 = vadd.f32 %v596_v6, %v125_v4  ;;  %v694_v13 = vmax.f32 %v664_v3, 0.0 }
 0x114   :  { %v598_v11 = vpop.f32.mrf.mxu0 }
 0x115   :  { %v671_v12 = vpop.f32.mrf.mxu1  ;;  %757 = vst.msk [vmem:[%s1318_s3 + $0x10] sm:$0xff] %vm1271_vm2, %v857_v8  ;;  %v695_v15 = vmax.f32 %v666_v9, 0.0  ;;  %v670_v16 = vadd.f32 %v669_v7, %v597_v10  ;;  %v599_v17 = vadd.f32 %v598_v11, %v125_v4 }
 0x116   :  { %v600_v18 = vpop.f32.mrf.mxu0 }
 0x117   :  { %v673_v19 = vpop.f32.mrf.mxu1  ;;  %v858_v20 = vpack.c.bf16 %v695_v15, %v694_v13  ;;  %v672_v21 = vadd.f32 %v671_v12, %v599_v17  ;;  %v601_v22 = vadd.f32 %v600_v18, %v130_v14  ;;  %v696_v25 = vmax.f32 %v670_v16, 0.0 }
 0x118   :  { %v602_v23 = vpop.f32.mrf.mxu0 }
 0x119   :  { %v675_v24 = vpop.f32.mrf.mxu1  ;;  %758 = vst.msk [vmem:[%s1318_s3 + $0x18] sm:$0xff] %vm1271_vm2, %v858_v20  ;;  %v697_v27 = vmax.f32 %v672_v21, 0.0  ;;  %v674_v28 = vadd.f32 %v673_v19, %v601_v22  ;;  %v603_v29 = vadd.f32 %v602_v23, %v130_v14 }
 0x11a   :  { %v606_v30 = vpop.f32.mrf.mxu0 }
 0x11b   :  { %v679_v31 = vpop.f32.mrf.mxu1  ;;  %v859_v32 = vpack.c.bf16 %v697_v27, %v696_v25  ;;  %v676_v33 = vadd.f32 %v675_v24, %v603_v29  ;;  %v607_v34 = vadd.f32 %v606_v30, %v135_v26  ;;  %v698_v38 = vmax.f32 %v674_v28, 0.0 }
 0x11c   :  { %v608_v35 = vpop.f32.mrf.mxu0 }
 0x11d   :  { %v681_v36 = vpop.f32.mrf.mxu1  ;;  %759 = vst.msk [vmem:[%s1318_s3 + $0x20] sm:$0xff] %vm1271_vm2, %v859_v32  ;;  %v699_v39 = vmax.f32 %v676_v33, 0.0  ;;  %v680_v40 = vadd.f32 %v679_v31, %v607_v34  ;;  %v609_v41 = vadd.f32 %v608_v35, %v135_v26 }
 0x11e   :  { %v610_v42 = vpop.f32.mrf.mxu0 }
 0x11f   :  { %v683_v43 = vpop.f32.mrf.mxu1  ;;  %v860_v44 = vpack.c.bf16 %v699_v39, %v698_v38  ;;  %v682_v46 = vadd.f32 %v681_v36, %v609_v41  ;;  %v611_v47 = vadd.f32 %v610_v42, %v140_v37  ;;  %v700_v49 = vmax.f32 %v680_v40, 0.0 }
 0x120   :  { %v612_v48 = vpop.f32.mrf.mxu0 }
 0x121   :  { %760 = vst.msk [vmem:[%s1318_s3 + $0x28] sm:$0xff] %vm1271_vm2, %v860_v44  ;;  %v701_v50 = vmax.f32 %v682_v46, 0.0  ;;  %v684_v51 = vadd.f32 %v683_v43, %v611_v47  ;;  %v613_v52 = vadd.f32 %v612_v48, %v140_v37  ;;  %v685_v53 = vpop.f32.mrf.mxu1 }
 0x123   :  { %v861_v54 = vpack.c.bf16 %v701_v50, %v700_v49  ;;  %v686_v55 = vadd.f32 %v685_v53, %v613_v52  ;;  %v702_v56 = vmax.f32 %v684_v51, 0.0 }
 0x125   :  { %761 = vst.msk [vmem:[%s1318_s3 + $0x30] sm:$0xff] %vm1271_vm2, %v861_v54  ;;  %v703_v57 = vmax.f32 %v686_v55, 0.0 }
 0x127   :  { %v862_v58 = vpack.c.bf16 %v703_v57, %v702_v56 }
 0x129   :  { %762 = vst.msk [vmem:[%s1318_s3 + $0x38] sm:$0xff] %vm1271_vm2, %v862_v58 }

// kernel: dqn_forward.6
= control target key start
LH: loop header
LB: loop body
LE: loop exit
PB: predicated region body
PF: predicated region fallthrough
CT: control target
= control target key end

     0   :  { %v991_v1 = vmov 0   ;;  %vm475_vm0 = vcmask 523264   ;;  %vm723_vm1 = vcmask 797696   ;;  %s1240_s1 = inlined_call_operand.vmem [shape: bf16[576,98], index: 1, kind: input, shape index: {}]   ;;  %s1241_s0 = inlined_call_operand.vmem [shape: bf16[64,576], index: 0, kind: input, shape index: {}]   ;;  %s1242_s2 = inlined_call_operand.vmem [shape: f32[64,1], index: 2, kind: input, shape index: {}]   ;;  %s1243_s3 = inlined_call_operand.vmem [shape: bf16[64,98], index: 3, kind: output, shape index: {}]  }
   0x1   :  { %v927_v0 = vld [vmem:[%s1240_s1 + $0x78] sm:$0xff]   ;;  %925 = vset.pattern.permute.xlu0 %v991_v1  ;;  %926 = vset.pattern.permute.xlu1 %v991_v1  ;;  %v931_v5 = vld [vmem:[%s1240_s1 + $0x70] sm:$0xff]   ;;  %v935_v9 = vld [vmem:[%s1240_s1 + $0x68] sm:$0xff]  }
   0x2   :  { %v928_v2 = vld [vmem:[%s1240_s1 + $0xf8] sm:$0xff]   ;;  %812 = vmatprep.subr.bf16.mxu0 %v927_v0  ;;  %v932_v6 = vld [vmem:[%s1240_s1 + $0xf0] sm:$0xff]   ;;  %v936_v10 = vld [vmem:[%s1240_s1 + $0xe8] sm:$0xff]  }
   0x3   :  { %v929_v3 = vld [vmem:[%s1240_s1 + $0x38] sm:$0xff]   ;;  %852 = vmatprep.subr.bf16.mxu1 %v928_v2  ;;  %v933_v7 = vld [vmem:[%s1240_s1 + $0x30] sm:$0xff]   ;;  %v937_v11 = vld [vmem:[%s1240_s1 + $0x28] sm:$0xff]  }
   0x4   :  { %v930_v4 = vld [vmem:[%s1240_s1 + $0xb8] sm:$0xff]   ;;  %813 = vmatpush3.bf16.msra.mxu0 %v929_v3  ;;  %v934_v8 = vld [vmem:[%s1240_s1 + $0xb0] sm:$0xff]   ;;  %v938_v12 = vld [vmem:[%s1240_s1 + $0xa8] sm:$0xff]  }
   0x5   :  { %853 = vmatpush3.bf16.msra.mxu1 %v930_v4  ;;  %814 = vmatprep.subr.bf16.mxu0 %v931_v5  ;;  %v939_v13 = vld [vmem:[%s1240_s1 + $0x60] sm:$0xff]   ;;  %v943_v17 = vld [vmem:[%s1240_s1 + $0x58] sm:$0xff]   ;;  %v947_v21 = vld [vmem:[%s1240_s1 + $0x50] sm:$0xff]  }
   0x6   :  { %854 = vmatprep.subr.bf16.mxu1 %v932_v6  ;;  %v940_v14 = vld [vmem:[%s1240_s1 + $0xe0] sm:$0xff]   ;;  %v944_v18 = vld [vmem:[%s1240_s1 + $0xd8] sm:$0xff]   ;;  %v948_v22 = vld [vmem:[%s1240_s1 + $0xd0] sm:$0xff]  }
   0x7   :  { %v941_v15 = vld [vmem:[%s1240_s1 + $0x20] sm:$0xff]   ;;  %v945_v19 = vld [vmem:[%s1240_s1 + $0x18] sm:$0xff]   ;;  %v949_v23 = vld [vmem:[%s1240_s1 + $0x10] sm:$0xff]  }
   0x8   :  { %815 = vmatpush3.bf16.msra.mxu0 %v933_v7  ;;  %v942_v16 = vld [vmem:[%s1240_s1 + $0xa0] sm:$0xff]   ;;  %v946_v20 = vld [vmem:[%s1240_s1 + $0x98] sm:$0xff]   ;;  %v950_v24 = vld [vmem:[%s1240_s1 + $0x90] sm:$0xff]  }
   0x9   :  { %855 = vmatpush3.bf16.msra.mxu1 %v934_v8  ;;  %816 = vmatprep.subr.bf16.mxu0 %v935_v9  ;;  %v951_v25 = vld [vmem:[%s1240_s1 + $0x48] sm:$0xff]   ;;  %v955_v29 = vld [vmem:[%s1240_s1 + $0x40] sm:$0xff]   ;;  %v965_v37 = vld [vmem:[%s1240_s1 + $0x118] sm:$0xff]  }
   0xa   :  { %856 = vmatprep.subr.bf16.mxu1 %v936_v10  ;;  %v952_v26 = vld [vmem:[%s1240_s1 + $0xc8] sm:$0xff]   ;;  %v956_v30 = vld [vmem:[%s1240_s1 + $0xc0] sm:$0xff]   ;;  %v972_v40 = vld [vmem:[%s1240_s1 + $0x110] sm:$0xff]  }
   0xb   :  { %v953_v27 = vld [vmem:[%s1240_s1 + $0x8] sm:$0xff]   ;;  %v957_v31 = vld [vmem:[%s1240_s1] sm:$0xff]   ;;  %v975_v44 = vld [vmem:[%s1241_s0 + $0x5c] ss:$20 sps:$4 sm:$0xff]  }
   0xc   :  { %817 = vmatpush3.bf16.msra.mxu0 %v937_v11  ;;  %v954_v28 = vld [vmem:[%s1240_s1 + $0x88] sm:$0xff]   ;;  %v958_v32 = vld [vmem:[%s1240_s1 + $0x80] sm:$0xff]   ;;  %v980_v49 = vld [vmem:[%s1241_s0 + $0x7c] ss:$20 sps:$4 sm:$0xff]  }
   0xd   :  { %857 = vmatpush3.bf16.msra.mxu1 %v938_v12  ;;  %818 = vmatprep.subr.bf16.mxu0 %v939_v13  ;;  %v959_v33 = vld [vmem:[%s1241_s0] ss:$20 sps:$4 sm:$0xff]   ;;  %v961_v34 = vld [vmem:[%s1241_s0 + $0x4] ss:$20 sps:$4 sm:$0xff]   ;;  %v962_v35 = vld [vmem:[%s1241_s0 + $0x8] ss:$20 sps:$4 sm:$0xff]  }
   0xe   :  { %858 = vmatprep.subr.bf16.mxu1 %v940_v14  ;;  %v964_v36 = vld [vmem:[%s1241_s0 + $0xc] ss:$20 sps:$4 sm:$0xff]   ;;  %520 = vmatprep.mubr.bf16.mxu0 %v961_v34  ;;  %v968_v39 = vld [vmem:[%s1241_s0 + $0x34] ss:$20 sps:$4 sm:$0xff]   ;;  %v971_v42 = vld [vmem:[%s1241_s0 + $0x30] ss:$20 sps:$4 sm:$0xff]  }
   0xf   :  { %585 = vmatprep.mubr.bf16.mxu1 %v964_v36  ;;  %v966_v38 = vld [vmem:[%s1241_s0 + $0x2c] ss:$20 sps:$4 sm:$0xff]   ;;  %v970_v41 = vld [vmem:[%s1241_s0 + $0x28] ss:$20 sps:$4 sm:$0xff]   ;;  %v977_v47 = vld [vmem:[%s1241_s0 + $0x50] ss:$20 sps:$4 sm:$0xff]  }
  0x10   :  { %819 = vmatpush3.bf16.msra.mxu0 %v941_v15  ;;  %v973_v43 = vld [vmem:[%s1241_s0 + $0x54] ss:$20 sps:$4 sm:$0xff]   ;;  %v986_v46 = vld [vmem:[%s1240_s1 + $0x100] sm:$0xff]   ;;  %v978_v48 = vld [vmem:[%s1241_s0 + $0x58] ss:$20 sps:$4 sm:$0xff]  }
  0x11   :  { %859 = vmatpush3.bf16.msra.mxu1 %v942_v16  ;;  %820 = vmatprep.subr.bf16.mxu0 %v943_v17  ;;  %v979_v45 = vld [vmem:[%s1240_s1 + $0x108] sm:$0xff]   ;;  %v982_v50 = vld [vmem:[%s1241_s0 + $0x84] ss:$20 sps:$4 sm:$0xff]   ;;  %v113_v52 = vld [vmem:[%s1242_s2 + $0x10] sm:$0xff] }
  0x12   :  { %860 = vmatprep.subr.bf16.mxu1 %v944_v18  ;;  %v111_v51 = vld [vmem:[%s1242_s2] sm:$0xff]  ;;  %v112_v53 = vld [vmem:[%s1242_s2 + $0x8] sm:$0xff]  ;;  %131 = vperm.xlu1 %926, %v113_v52   ;;  %v114_v54 = vld [vmem:[%s1242_s2 + $0x18] sm:$0xff] }
  0x13   :  { %121 = vperm.xlu0 %925, %v111_v51   ;;  %v984_v55 = vld [vmem:[%s1241_s0 + $0x78] ss:$20 sps:$4 sm:$0xff]   ;;  %v985_v56 = vld [vmem:[%s1241_s0 + $0x80] ss:$20 sps:$4 sm:$0xff]   ;;  %v987_v57 = vld [vmem:[%s1241_s0 + $0x10] ss:$20 sps:$4 sm:$0xff]  }
  0x14   :  { %821 = vmatpush3.bf16.msra.mxu0 %v945_v19  ;;  %v115_v58 = vld [vmem:[%s1242_s2 + $0x20] sm:$0xff]  ;;  %v116_v60 = vld [vmem:[%s1242_s2 + $0x28] sm:$0xff]  ;;  %v117_v61 = vld [vmem:[%s1242_s2 + $0x30] sm:$0xff] }
  0x15   :  { %861 = vmatpush3.bf16.msra.mxu1 %v946_v20  ;;  %822 = vmatprep.subr.bf16.mxu0 %v947_v21  ;;  %v988_v59 = vld [vmem:[%s1241_s0 + $0x60] ss:$20 sps:$4 sm:$0xff]   ;;  %v118_v62 = vld [vmem:[%s1242_s2 + $0x38] sm:$0xff] }
  0x16   :  { %862 = vmatprep.subr.bf16.mxu1 %v948_v22  ;;  %136 = vperm.xlu1 %926, %v114_v54   ;;  %v989_v63 = vld [vmem:[%s1241_s0 + $0x38] ss:$20 sps:$4 sm:$0xff]   ;;  %v990_v0 = vld [vmem:[%s1241_s0 + $0x88] ss:$20 sps:$4 sm:$0xff]  }
  0x17   :  { %126 = vperm.xlu0 %925, %v112_v53  }
  0x18   :  { %823 = vmatpush3.bf16.msra.mxu0 %v949_v23 }
  0x19   :  { %863 = vmatpush3.bf16.msra.mxu1 %v950_v24  ;;  %824 = vmatprep.subr.bf16.mxu0 %v951_v25 }
  0x1a   :  { %864 = vmatprep.subr.bf16.mxu1 %v952_v26  ;;  %146 = vperm.xlu1 %926, %v116_v60  }
  0x1b   :  { %141 = vperm.xlu0 %925, %v115_v58  }
  0x1c   :  { %825 = vmatpush3.bf16.msra.mxu0 %v953_v27 }
  0x1d   :  { %865 = vmatpush3.bf16.msra.mxu1 %v954_v28  ;;  %826 = vmatprep.subr.bf16.mxu0 %v955_v29 }
  0x1e   :  { %866 = vmatprep.subr.bf16.mxu1 %v956_v30  ;;  %156 = vperm.xlu1 %926, %v118_v62  }
  0x1f   :  { %151 = vperm.xlu0 %925, %v117_v61  }
  0x20   :  { %827 = vmatpush3.bf16.msra.mxu0 %v957_v31 }
  0x21   :  { %867 = vmatpush3.bf16.msra.mxu1 %v958_v32  ;;  %900 = vmatprep.subr.bf16.mxu0 %v965_v37 }
  0x22   :  { %916 = vmatprep.subr.bf16.mxu1 %v965_v37 }
  0x23   :  { %521 = vmatmul.mubr.bf16.vlgmr.msra.gmra.mxu0 %v959_v33 }
  0x24   :  { %586 = vmatmul.mubr.bf16.vlgmr.msra.gmra.mxu1 %v962_v35  ;;  %901 = vmatpush3.bf16.msra.mxu0 %v965_v37 }
  0x25   :  { %920 = vmatpush3.bf16.msra.mxu1 %v965_v37  ;;  %528 = vmatprep.mubr.bf16.mxu0 %v966_v38 }
  0x26   :  { %593 = vmatprep.mubr.bf16.mxu1 %v968_v39  ;;  %902 = vmatprep.subr.bf16.mxu0 %v972_v40 }
  0x27   :  { %917 = vmatprep.subr.bf16.mxu1 %v972_v40 }
  0x28   :  { %903 = vmatpush3.bf16.msra.mxu0 %v972_v40 }
  0x29   :  { %921 = vmatpush3.bf16.msra.mxu1 %v972_v40  ;;  %904 = vmatprep.subr.bf16.mxu0 %v979_v45 }
  0x2a   :  { %918 = vmatprep.subr.bf16.mxu1 %v979_v45 }
  0x2b   :  { %529 = vmatmul.mubr.bf16.gmra.mxu0 %v970_v41 }
  0x2c   :  { %594 = vmatmul.mubr.bf16.gmra.mxu1 %v971_v42  ;;  %536 = vmatprep.mubr.bf16.mxu0 %v973_v43 }
  0x2d   :  { %601 = vmatprep.mubr.bf16.mxu1 %v975_v44  ;;  %905 = vmatpush3.bf16.msra.mxu0 %v979_v45 }
  0x2e   :  { %922 = vmatpush3.bf16.msra.mxu1 %v979_v45  ;;  %906 = vmatprep.subr.bf16.mxu0 %v986_v46 }
  0x2f   :  { %919 = vmatprep.subr.bf16.mxu1 %v986_v46 }
  0x31   :  { %907 = vmatpush3.bf16.msra.mxu0 %v986_v46 }
  0x32   :  { %923 = vmatpush3.bf16.msra.mxu1 %v986_v46 }
  0x33   :  { %537 = vmatmul.mubr.bf16.gmra.mxu0 %v977_v47 }
  0x34   :  { %602 = vmatmul.mubr.bf16.gmra.mxu1 %v978_v48  ;;  %544 = vmatprep.mubr.bf16.mxu0 %v980_v49 }
  0x35   :  { %609 = vmatprep.mubr.bf16.mxu1 %v982_v50 }
  0x3b   :  { %545 = vmatmul.mubr.bf16.gmra.mxu0 %v984_v55 }
  0x3c   :  { %610 = vmatmul.mubr.bf16.gmra.mxu1 %v985_v56  ;;  %908 = vmatprep.mubr.msk.bf16.mxu0 %vm475_vm0, %v987_v57 }
  0x3d   :  { %912 = vmatprep.mubr.msk.bf16.mxu1 %vm475_vm0, %v988_v59 }
  0x43   :  { %909 = vmatmul.mubr.msk.bf16.vlgmr.msra.gmra.mxu0 %vm475_vm0, %v989_v63 }
  0x44   :  { %913 = vmatmul.mubr.msk.bf16.vlgmr.msra.gmra.mxu1 %vm475_vm0, %v990_v0 }
  0x8d   :  { %v132_v16 = vpop.permute.xlu1 %131 }
  0x8e   :  { %v122_v13 = vpop.permute.xlu0 %121 }
  0x91   :  { %v137_v24 = vpop.permute.xlu1 %136 }
  0x92   :  { %v127_v21 = vpop.permute.xlu0 %126 }
  0x95   :  { %v147_v35 = vpop.permute.xlu1 %146 }
  0x96   :  { %v142_v27 = vpop.permute.xlu0 %141 }
  0x99   :  { %v157_v60 = vpop.permute.xlu1 %156 }
  0x9a   :  { %v152_v43 = vpop.permute.xlu0 %151 }
  0xe3   :  { %v828_v1 = vpop.f32.mrf.mxu0 }
  0xe4   :  { %v868_v2 = vpop.f32.mrf.mxu1 }
  0xe5   :  { %v829_v3 = vpop.f32.mrf.mxu0 }
  0xe6   :  { %v869_v4 = vpop.f32.mrf.mxu1  ;;  %v830_v31 = vadd.f32 %v829_v3, %v828_v1 }
  0xe7   :  { %v831_v5 = vpop.f32.mrf.mxu0  ;;  %v870_v49 = vadd.f32 %v869_v4, %v868_v2 }
  0xe8   :  { %v871_v6 = vpop.f32.mrf.mxu1  ;;  %v523_v41 = vadd.f32 %v830_v31, %v122_v13 }
  0xe9   :  { %v832_v7 = vpop.f32.mrf.mxu0 }
  0xea   :  { %v872_v8 = vpop.f32.mrf.mxu1  ;;  %v833_v42 = vadd.f32 %v832_v7, %v831_v5  ;;  %v588_v62 = vadd.f32 %v870_v49, %v523_v41 }
  0xeb   :  { %v834_v9 = vpop.f32.mrf.mxu0  ;;  %v873_v7 = vadd.f32 %v872_v8, %v871_v6 }
  0xec   :  { %v874_v10 = vpop.f32.mrf.mxu1  ;;  %v526_v58 = vadd.f32 %v833_v42, %v127_v21 }
  0xed   :  { %v835_v11 = vpop.f32.mrf.mxu0 }
  0xee   :  { %v875_v12 = vpop.f32.mrf.mxu1  ;;  %v836_v29 = vadd.f32 %v835_v11, %v834_v9 }
  0xef   :  { %v837_v14 = vpop.f32.mrf.mxu0  ;;  %v876_v45 = vadd.f32 %v875_v12, %v874_v10 }
  0xf0   :  { %v877_v15 = vpop.f32.mrf.mxu1  ;;  %v531_v37 = vadd.f32 %v836_v29, %v132_v16 }
  0xf1   :  { %v838_v17 = vpop.f32.mrf.mxu0 }
  0xf2   :  { %v878_v18 = vpop.f32.mrf.mxu1  ;;  %v839_v38 = vadd.f32 %v838_v17, %v837_v14  ;;  %v596_v56 = vadd.f32 %v876_v45, %v531_v37 }
  0xf3   :  { %v840_v19 = vpop.f32.mrf.mxu0  ;;  %v879_v63 = vadd.f32 %v878_v18, %v877_v15 }
  0xf4   :  { %v880_v20 = vpop.f32.mrf.mxu1  ;;  %v534_v53 = vadd.f32 %v839_v38, %v137_v24  ;;  %v591_v24 = vadd.f32 %v873_v7, %v526_v58 }
  0xf5   :  { %v841_v22 = vpop.f32.mrf.mxu0 }
  0xf6   :  { %v881_v23 = vpop.f32.mrf.mxu1  ;;  %v842_v34 = vadd.f32 %v841_v22, %v840_v19  ;;  %v599_v14 = vadd.f32 %v879_v63, %v534_v53 }
  0xf7   :  { %v843_v25 = vpop.f32.mrf.mxu0  ;;  %v882_v59 = vadd.f32 %v881_v23, %v880_v20 }
  0xf8   :  { %v883_v26 = vpop.f32.mrf.mxu1  ;;  %v539_v50 = vadd.f32 %v842_v34, %v142_v27 }
  0xf9   :  { %v844_v28 = vpop.f32.mrf.mxu0 }
  0xfa   :  { %v884_v30 = vpop.f32.mrf.mxu1  ;;  %v845_v51 = vadd.f32 %v844_v28, %v843_v25  ;;  %v604_v10 = vadd.f32 %v882_v59, %v539_v50 }
  0xfb   :  { %v846_v32 = vpop.f32.mrf.mxu0  ;;  %v885_v17 = vadd.f32 %v884_v30, %v883_v26 }
  0xfc   :  { %v886_v33 = vpop.f32.mrf.mxu1  ;;  %v542_v2 = vadd.f32 %v845_v51, %v147_v35 }
  0xfd   :  { %v847_v36 = vpop.f32.mrf.mxu0 }
  0xfe   :  { %v848_v39 = vadd.f32 %v847_v36, %v846_v32  ;;  %v887_v40 = vpop.f32.mrf.mxu1  ;;  %v607_v28 = vadd.f32 %v885_v17, %v542_v2 }
  0xff   :  { %v849_v44 = vpop.f32.mrf.mxu0  ;;  %v888_v47 = vadd.f32 %v887_v40, %v886_v33 }
 0x100   :  { %v547_v46 = vadd.f32 %v848_v39, %v152_v43  ;;  %v889_v48 = vpop.f32.mrf.mxu1 }
 0x101   :  { %v850_v52 = vpop.f32.mrf.mxu0 }
 0x102   :  { %v851_v54 = vadd.f32 %v850_v52, %v849_v44  ;;  %v890_v55 = vpop.f32.mrf.mxu1  ;;  %v612_v57 = vadd.f32 %v888_v47, %v547_v46 }
 0x103   :  { %v910_v61 = vpop.f32.mrf.mxu0  ;;  %v891_v1 = vadd.f32 %v890_v55, %v889_v48 }
 0x104   :  { %v550_v0 = vadd.f32 %v851_v54, %v157_v60  ;;  %v661_v3 = vadd.f32 %v910_v61, %v596_v56  ;;  %v914_v5 = vpop.f32.mrf.mxu1 }
 0x105   :  { %v677_v4 = vadd.f32 %v914_v5, %v612_v57  ;;  %v652_v9 = vpop.f32.mrf.mxu0 }
 0x106   :  { %v685_v11 = vmax.f32 %v661_v3, 0.0  ;;  %v653_v12 = vadd.f32 %v652_v9, %v588_v62  ;;  %v668_v13 = vpop.f32.mrf.mxu1  ;;  %v615_v16 = vadd.f32 %v891_v1, %v550_v0 }
 0x107   :  { %v689_v19 = vmax.f32 %v677_v4, 0.0  ;;  %v669_v20 = vadd.f32 %v668_v13, %v604_v10  ;;  %v911_v21 = vpop.f32.mrf.mxu0 }
 0x108   :  { %v806_v15 = vpack.c.bf16 %v685_v11, %v685_v11  ;;  %v683_v18 = vmax.f32 %v653_v12, 0.0  ;;  %v664_v22 = vadd.f32 %v911_v21, %v599_v14  ;;  %v915_v23 = vpop.f32.mrf.mxu1 }
 0x109   :  { %v810_v6 = vpack.c.bf16 %v689_v19, %v689_v19  ;;  %v687_v8 = vmax.f32 %v669_v20, 0.0  ;;  %v680_v25 = vadd.f32 %v915_v23, %v615_v16  ;;  %v655_v27 = vpop.f32.mrf.mxu0 }
 0x10a   :  { %726 = vst.msk [vmem:[%s1243_s3 + $0x8] sm:$0xf] %vm723_vm1, %v806_v15  ;;  %v804_v26 = vpack.c.bf16 %v683_v18, %v683_v18  ;;  %v686_v29 = vmax.f32 %v664_v22, 0.0  ;;  %v656_v30 = vadd.f32 %v655_v27, %v591_v24  ;;  %v671_v31 = vpop.f32.mrf.mxu1 }
 0x10b   :  { %730 = vst.msk [vmem:[%s1243_s3 + $0x18] sm:$0xf] %vm723_vm1, %v810_v6  ;;  %v808_v32 = vpack.c.bf16 %v687_v8, %v687_v8  ;;  %v690_v33 = vmax.f32 %v680_v25, 0.0  ;;  %v672_v34 = vadd.f32 %v671_v31, %v607_v28 }
 0x10c   :  { %724 = vst.msk [vmem:[%s1243_s3] sm:$0xf] %vm723_vm1, %v804_v26  ;;  %v807_v35 = vpack.c.bf16 %v686_v29, %v686_v29  ;;  %v684_v36 = vmax.f32 %v656_v30, 0.0 }
 0x10d   :  { %728 = vst.msk [vmem:[%s1243_s3 + $0x10] sm:$0xf] %vm723_vm1, %v808_v32  ;;  %v811_v37 = vpack.c.bf16 %v690_v33, %v690_v33  ;;  %v688_v38 = vmax.f32 %v672_v34, 0.0 }
 0x10e   :  { %727 = vst.msk [vmem:[%s1243_s3 + $0xc] sm:$0xf] %vm723_vm1, %v807_v35  ;;  %v805_v39 = vpack.c.bf16 %v684_v36, %v684_v36 }
 0x10f   :  { %731 = vst.msk [vmem:[%s1243_s3 + $0x1c] sm:$0xf] %vm723_vm1, %v811_v37  ;;  %v809_v40 = vpack.c.bf16 %v688_v38, %v688_v38 }
 0x110   :  { %725 = vst.msk [vmem:[%s1243_s3 + $0x4] sm:$0xf] %vm723_vm1, %v805_v39 }
 0x111   :  { %729 = vst.msk [vmem:[%s1243_s3 + $0x14] sm:$0xf] %vm723_vm1, %v809_v40 }

// kernel: dqn_forward.7
= control target key start
LH: loop header
LB: loop body
LE: loop exit
PB: predicated region body
PF: predicated region fallthrough
CT: control target
= control target key end

     0   :  { %10 = vsyncpa [#allocation4], 0  ;;  %s2599_s18 = smov 0   ;;  %s2954_s0 = inlined_call_operand.vmem [shape: bf16[2,3200], index: 0, kind: input, shape index: {}]   ;;  %s2955_s1 = inlined_call_operand.vmem [shape: bf16[3200,512], index: 1, kind: input, shape index: {}]   ;;  %s2956_s2 = inlined_call_operand.vmem [shape: f32[1,512], index: 2, kind: input, shape index: {}]   ;;  %s2957_s3 = inlined_call_operand.vmem [shape: bf16[512,128], index: 3, kind: input, shape index: {}]   ;;  %s2958_s4 = inlined_call_operand.vmem [shape: f32[1,128], index: 4, kind: input, shape index: {}]   ;;  %s2959_s5 = inlined_call_operand.hbm [shape: f32[2,128], index: 5, kind: output, shape index: {}]  }
   0x1 LB: > { %s2605_s19 = sadd.s32 4294967295, %s2562_s18   ;;  %p1989_p0 = scmp.ge.s32.totalorder %s2562_s18, 1  ;;  %s2562_s18 = sphi %s2599_s18, %s16_s18  }
   0x2   : > { %p195_p1 = scmp.lt.s32.totalorder %s2562_s18, 6 }
   0x4   : > { %p196_p2 = pnand %p1989_p0, %p195_p1 }
   0x5   : > { %s223_s20 = smul.u32 (!%p196_p2), 5, %s2605_s19  ;;  %p1992_p5 = scmp.ne.s32.totalorder (!%p196_p2), %s2605_s19, 0 }
   0x6   : > { %199 = sbr.rel (%p196_p2) target bundleno = 640 (0x280), region = 40 }
   0x7   : > { %s228_s21 = smul.u32 (!%p196_p2), 80, %s2605_s19  ;;  %p224_p3 = scmp.lt.s32.totalorder (!%p196_p2), %s223_s20, 24 }
   0x9   : > { %p229_p4 = scmp.lt.s32.totalorder (!%p196_p2), %s228_s21, 399 }
   0xb   : > { %s2961_s20 = smov (!%p224_p3, %s223_s20), 24  ;;  %s2963_s21 = smov (!%p229_p4, %s228_s21), 399 }
   0xc   : > { %s226_s24 = scalar_lea.vmem %s2954_s0, %s2961_s20  ;;  %s2191_s25 = sshll.u32 %s2963_s21, 4 }
   0xd   : > { %s2620_s28 = scalar_lea.vmem %s2955_s1, %s2191_s25  ;;  %239 = sbr.rel (%p1992_p5) target bundleno = 20 (0x14), region = 44 }
  0x12   : > { %v2564_v0 = vmov 0.0  }
  0x13   : > { %240 = vst [vmem:[#allocation2] sm:$0xff] %v2564_v0 }
  0x14 PF: > { %v2255_v1 = vld [vmem:[%s2620_s28 + $0xe4] ss:$16 sps:$4 sm:$0xff]   ;;  %v2259_v3 = vld [vmem:[%s2620_s28 + $0xe0] ss:$16 sps:$4 sm:$0xff]   ;;  %v2565_v37 = vmov 1966171168   ;;  %v408_v39 = vlaneseq }
  0x15   : > { %v2257_v2 = vld [vmem:[%s2620_s28 + $0x2e4] ss:$16 sps:$4 sm:$0xff]   ;;  %1248 = vmatprep.subr.bf16.mxu0 %v2255_v1  ;;  %v2260_v4 = vld [vmem:[%s2620_s28 + $0x2e0] ss:$16 sps:$4 sm:$0xff]   ;;  %v406_v38 = vunpack.c.l.s4 %v2565_v37  ;;  %p2153_p6 = scmp.ne.s32.totalorder %s2605_s19, 4 }
  0x16   : > { %1289 = vmatprep.subr.bf16.mxu1 %v2257_v2  ;;  %v2261_v5 = vld [vmem:[%s2620_s28 + $0xc4] ss:$16 sps:$4 sm:$0xff]   ;;  %1249 = vmatpush1.bf16.msra.mxu0 %v2259_v3  ;;  %v2265_v7 = vld [vmem:[%s2620_s28 + $0xc0] ss:$16 sps:$4 sm:$0xff]   ;;  %v2662_v44 = vshrl.u32 %v408_v39, 7 }
  0x17   : > { %1290 = vmatpush1.bf16.msra.mxu1 %v2260_v4  ;;  %v2263_v6 = vld [vmem:[%s2620_s28 + $0x2c4] ss:$16 sps:$4 sm:$0xff]   ;;  %1250 = vmatprep.subr.bf16.mxu0 %v2261_v5  ;;  %v2266_v8 = vld [vmem:[%s2620_s28 + $0x2c0] ss:$16 sps:$4 sm:$0xff]   ;;  %v407_v43 = vunpack.c.0.s8 %v406_v38  ;;  %v2385_v38 = vld [vmem:[%s2620_s28 + $0x48] ss:$16 sps:$4 sm:$0xff]  }
  0x18   : > { %1291 = vmatprep.subr.bf16.mxu1 %v2263_v6  ;;  %v2267_v9 = vld [vmem:[%s2620_s28 + $0xa4] ss:$16 sps:$4 sm:$0xff]   ;;  %v2271_v11 = vld [vmem:[%s2620_s28 + $0xa0] ss:$16 sps:$4 sm:$0xff]  }
  0x19   : > { %v2269_v10 = vld [vmem:[%s2620_s28 + $0x2a4] ss:$16 sps:$4 sm:$0xff]   ;;  %v2272_v12 = vld [vmem:[%s2620_s28 + $0x2a0] ss:$16 sps:$4 sm:$0xff]   ;;  %v2670_v50 = vsub.s32 %v407_v43, %v2662_v44  ;;  %v2391_v43 = vld [vmem:[%s2620_s28 + $0x28] ss:$16 sps:$4 sm:$0xff]  }
  0x1a   : > { %1251 = vmatpush1.bf16.msra.mxu0 %v2265_v7  ;;  %v2273_v13 = vld [vmem:[%s2620_s28 + $0x84] ss:$16 sps:$4 sm:$0xff]   ;;  %v2277_v15 = vld [vmem:[%s2620_s28 + $0x80] ss:$16 sps:$4 sm:$0xff]  }
  0x1b   : > { %1292 = vmatpush1.bf16.msra.mxu1 %v2266_v8  ;;  %1252 = vmatprep.subr.bf16.mxu0 %v2267_v9  ;;  %v2275_v14 = vld [vmem:[%s2620_s28 + $0x284] ss:$16 sps:$4 sm:$0xff]   ;;  %v2278_v16 = vld [vmem:[%s2620_s28 + $0x280] ss:$16 sps:$4 sm:$0xff]  }
  0x1c   : > { %1293 = vmatprep.subr.bf16.mxu1 %v2269_v10  ;;  %v2279_v17 = vld [vmem:[%s2620_s28 + $0x64] ss:$16 sps:$4 sm:$0xff]   ;;  %v2283_v19 = vld [vmem:[%s2620_s28 + $0x60] ss:$16 sps:$4 sm:$0xff]  }
  0x1d   : > { %v2281_v18 = vld [vmem:[%s2620_s28 + $0x264] ss:$16 sps:$4 sm:$0xff]   ;;  %v2284_v20 = vld [vmem:[%s2620_s28 + $0x260] ss:$16 sps:$4 sm:$0xff]  }
  0x1e   : > { %1253 = vmatpush1.bf16.msra.mxu0 %v2271_v11  ;;  %v2285_v21 = vld [vmem:[%s2620_s28 + $0x44] ss:$16 sps:$4 sm:$0xff]   ;;  %v2289_v23 = vld [vmem:[%s2620_s28 + $0x40] ss:$16 sps:$4 sm:$0xff]  }
  0x1f   : > { %1294 = vmatpush1.bf16.msra.mxu1 %v2272_v12  ;;  %1254 = vmatprep.subr.bf16.mxu0 %v2273_v13  ;;  %v2287_v22 = vld [vmem:[%s2620_s28 + $0x244] ss:$16 sps:$4 sm:$0xff]   ;;  %v2290_v24 = vld [vmem:[%s2620_s28 + $0x240] ss:$16 sps:$4 sm:$0xff]  }
  0x20   : > { %1295 = vmatprep.subr.bf16.mxu1 %v2275_v14  ;;  %v2291_v25 = vld [vmem:[%s2620_s28 + $0x24] ss:$16 sps:$4 sm:$0xff]   ;;  %v2295_v27 = vld [vmem:[%s2620_s28 + $0x20] ss:$16 sps:$4 sm:$0xff]   ;;  %v2357_v14 = vld [vmem:[%s2620_s28 + $0xec] ss:$16 sps:$4 sm:$0xff]  }
  0x21   : > { %v2293_v26 = vld [vmem:[%s2620_s28 + $0x224] ss:$16 sps:$4 sm:$0xff]   ;;  %v2296_v28 = vld [vmem:[%s2620_s28 + $0x220] ss:$16 sps:$4 sm:$0xff]  }
  0x22   : > { %1255 = vmatpush1.bf16.msra.mxu0 %v2277_v15  ;;  %v2297_v29 = vld [vmem:[%s2620_s28 + $0x4] ss:$16 sps:$4 sm:$0xff]   ;;  %v2301_v31 = vld [vmem:[%s2620_s28] ss:$16 sps:$4 sm:$0xff]  }
  0x23   : > { %1296 = vmatpush1.bf16.msra.mxu1 %v2278_v16  ;;  %1256 = vmatprep.subr.bf16.mxu0 %v2279_v17  ;;  %v2299_v30 = vld [vmem:[%s2620_s28 + $0x204] ss:$16 sps:$4 sm:$0xff]   ;;  %v2302_v32 = vld [vmem:[%s2620_s28 + $0x200] ss:$16 sps:$4 sm:$0xff]   ;;  %v2355_v17 = vld [vmem:[%s2620_s28 + $0xe8] ss:$16 sps:$4 sm:$0xff]  }
  0x24   : > { %1297 = vmatprep.subr.bf16.mxu1 %v2281_v18  ;;  %v2303_v33 = vld [vmem:[%s2620_s28 + $0x1e4] ss:$16 sps:$4 sm:$0xff]   ;;  %v2307_v35 = vld [vmem:[%s2620_s28 + $0x1e0] ss:$16 sps:$4 sm:$0xff]  }
  0x25   : > { %v2305_v34 = vld [vmem:[%s2620_s28 + $0x3e4] ss:$16 sps:$4 sm:$0xff]   ;;  %v2308_v36 = vld [vmem:[%s2620_s28 + $0x3e0] ss:$16 sps:$4 sm:$0xff]  }
  0x26   : > { %1257 = vmatpush1.bf16.msra.mxu0 %v2283_v19  ;;  %v2309_v40 = vld [vmem:[%s2620_s28 + $0x1c4] ss:$16 sps:$4 sm:$0xff]   ;;  %v2313_v42 = vld [vmem:[%s2620_s28 + $0x1c0] ss:$16 sps:$4 sm:$0xff]   ;;  %v2363_v19 = vld [vmem:[%s2620_s28 + $0xcc] ss:$16 sps:$4 sm:$0xff]  }
  0x27   : > { %1298 = vmatpush1.bf16.msra.mxu1 %v2284_v20  ;;  %1258 = vmatprep.subr.bf16.mxu0 %v2285_v21  ;;  %v2311_v41 = vld [vmem:[%s2620_s28 + $0x3c4] ss:$16 sps:$4 sm:$0xff]   ;;  %v2314_v45 = vld [vmem:[%s2620_s28 + $0x3c0] ss:$16 sps:$4 sm:$0xff]   ;;  %v2361_v21 = vld [vmem:[%s2620_s28 + $0xc8] ss:$16 sps:$4 sm:$0xff]  }
  0x28   : > { %1299 = vmatprep.subr.bf16.mxu1 %v2287_v22  ;;  %v2315_v46 = vld [vmem:[%s2620_s28 + $0x1a4] ss:$16 sps:$4 sm:$0xff]   ;;  %v2319_v48 = vld [vmem:[%s2620_s28 + $0x1a0] ss:$16 sps:$4 sm:$0xff]  }
  0x29   : > { %v2317_v47 = vld [vmem:[%s2620_s28 + $0x3a4] ss:$16 sps:$4 sm:$0xff]   ;;  %v2320_v49 = vld [vmem:[%s2620_s28 + $0x3a0] ss:$16 sps:$4 sm:$0xff]  }
  0x2a   : > { %1259 = vmatpush1.bf16.msra.mxu0 %v2289_v23  ;;  %v2321_v51 = vld [vmem:[%s2620_s28 + $0x184] ss:$16 sps:$4 sm:$0xff]   ;;  %v2325_v54 = vld [vmem:[%s2620_s28 + $0x180] ss:$16 sps:$4 sm:$0xff]   ;;  %v2369_v23 = vld [vmem:[%s2620_s28 + $0xac] ss:$16 sps:$4 sm:$0xff]  }
  0x2b   : > { %1300 = vmatpush1.bf16.msra.mxu1 %v2290_v24  ;;  %1260 = vmatprep.subr.bf16.mxu0 %v2291_v25  ;;  %v2323_v52 = vld [vmem:[%s2620_s28 + $0x384] ss:$16 sps:$4 sm:$0xff]   ;;  %v2326_v56 = vld [vmem:[%s2620_s28 + $0x380] ss:$16 sps:$4 sm:$0xff]   ;;  %v2566_v24 = vmov 0  }
  0x2c   : > { %1301 = vmatprep.subr.bf16.mxu1 %v2293_v26  ;;  %v2679_v53 = vld [vmem:[%s226_s24] sm:$0x1f]  ;;  %v2367_v26 = vld [vmem:[%s2620_s28 + $0xa8] ss:$16 sps:$4 sm:$0xff]  }
  0x2d   : > { %v411_v55 = vrot.slane %v2679_v53, %v2670_v50  ;;  %v2327_v57 = vld [vmem:[%s2620_s28 + $0x164] ss:$16 sps:$4 sm:$0xff]   ;;  %v2331_v60 = vld [vmem:[%s2620_s28 + $0x160] ss:$16 sps:$4 sm:$0xff]  }
  0x2e   : > { %1261 = vmatpush1.bf16.msra.mxu0 %v2295_v27  ;;  %v2329_v58 = vld [vmem:[%s2620_s28 + $0x364] ss:$16 sps:$4 sm:$0xff]   ;;  %v2332_v62 = vld [vmem:[%s2620_s28 + $0x360] ss:$16 sps:$4 sm:$0xff]  }
  0x2f   : > { %1302 = vmatpush1.bf16.msra.mxu1 %v2296_v28  ;;  %1262 = vmatprep.subr.bf16.mxu0 %v2297_v29  ;;  %v419_v59 = vcombine.high %v411_v55, %v411_v55  ;;  %v2333_v63 = vld [vmem:[%s2620_s28 + $0x144] ss:$16 sps:$4 sm:$0xff]   ;;  %v2337_v2 = vld [vmem:[%s2620_s28 + $0x140] ss:$16 sps:$4 sm:$0xff]   ;;  %v2705_v11 = vrot.slane %v411_v55, %v2670_v50  ;;  %v2375_v28 = vld [vmem:[%s2620_s28 + $0x8c] ss:$16 sps:$4 sm:$0xff]  }
  0x30   : > { %1303 = vmatprep.subr.bf16.mxu1 %v2299_v30  ;;  %v2335_v0 = vld [vmem:[%s2620_s28 + $0x344] ss:$16 sps:$4 sm:$0xff]   ;;  %v2338_v3 = vld [vmem:[%s2620_s28 + $0x340] ss:$16 sps:$4 sm:$0xff]   ;;  %v2373_v30 = vld [vmem:[%s2620_s28 + $0x88] ss:$16 sps:$4 sm:$0xff]  }
  0x31   : > { %v440_v61 = vrot.slane %v419_v59, %v2670_v50  ;;  %v2339_v4 = vld [vmem:[%s2620_s28 + $0x124] ss:$16 sps:$4 sm:$0xff]   ;;  %v2343_v6 = vld [vmem:[%s2620_s28 + $0x120] ss:$16 sps:$4 sm:$0xff]   ;;  %v2712_v15 = vcombine.high %v2705_v11, %v2705_v11  ;;  %v2403_v55 = vld [vmem:[%s2620_s28 + $0x2e8] ss:$16 sps:$4 sm:$0xff]  }
  0x32   : > { %1263 = vmatpush1.bf16.msra.mxu0 %v2301_v31  ;;  %v2341_v5 = vld [vmem:[%s2620_s28 + $0x324] ss:$16 sps:$4 sm:$0xff]   ;;  %v2344_v7 = vld [vmem:[%s2620_s28 + $0x320] ss:$16 sps:$4 sm:$0xff]   ;;  %v2414_v59 = vld [vmem:[%s2620_s28 + $0x1ac] ss:$16 sps:$4 sm:$0xff]  }
  0x33   : > { %1304 = vmatpush1.bf16.msra.mxu1 %v2302_v32  ;;  %1264 = vmatprep.subr.bf16.mxu0 %v2303_v33  ;;  %v2692_v1 = vcombine.high %v440_v61, %v440_v61  ;;  %v2345_v8 = vld [vmem:[%s2620_s28 + $0x104] ss:$16 sps:$4 sm:$0xff]   ;;  %v2349_v10 = vld [vmem:[%s2620_s28 + $0x100] ss:$16 sps:$4 sm:$0xff]   ;;  %v2381_v32 = vld [vmem:[%s2620_s28 + $0x6c] ss:$16 sps:$4 sm:$0xff]  }
  0x34   : > { %1305 = vmatprep.subr.bf16.mxu1 %v2305_v34  ;;  %1280 = vmatprep.mubr.bf16.mxu0 %v440_v61  ;;  %v2347_v9 = vld [vmem:[%s2620_s28 + $0x304] ss:$16 sps:$4 sm:$0xff]   ;;  %v2350_v12 = vld [vmem:[%s2620_s28 + $0x300] ss:$16 sps:$4 sm:$0xff]   ;;  %v2379_v34 = vld [vmem:[%s2620_s28 + $0x68] ss:$16 sps:$4 sm:$0xff]  }
  0x35   : > { %1321 = vmatprep.mubr.bf16.mxu1 %v2692_v1  ;;  %v2354_v13 = vld [vmem:[%s2620_s28 + $0x4e4] ss:$16 sps:$4 sm:$0xff]   ;;  %v2352_v16 = vld [vmem:[%s2620_s28 + $0x4e0] ss:$16 sps:$4 sm:$0xff]  }
  0x36   : > { %1265 = vmatpush2.bf16.msra.mxu0 %v2307_v35  ;;  %v2360_v18 = vld [vmem:[%s2620_s28 + $0x4c4] ss:$16 sps:$4 sm:$0xff]   ;;  %v2358_v20 = vld [vmem:[%s2620_s28 + $0x4c0] ss:$16 sps:$4 sm:$0xff]  }
  0x37   : > { %1306 = vmatpush2.bf16.msra.mxu1 %v2308_v36  ;;  %1266 = vmatprep.subr.bf16.mxu0 %v2309_v40  ;;  %v2366_v22 = vld [vmem:[%s2620_s28 + $0x4a4] ss:$16 sps:$4 sm:$0xff]   ;;  %v2364_v25 = vld [vmem:[%s2620_s28 + $0x4a0] ss:$16 sps:$4 sm:$0xff]   ;;  %v2387_v36 = vld [vmem:[%s2620_s28 + $0x4c] ss:$16 sps:$4 sm:$0xff]  }
  0x38   : > { %1307 = vmatprep.subr.bf16.mxu1 %v2311_v41  ;;  %v2372_v27 = vld [vmem:[%s2620_s28 + $0x484] ss:$16 sps:$4 sm:$0xff]   ;;  %v2370_v29 = vld [vmem:[%s2620_s28 + $0x480] ss:$16 sps:$4 sm:$0xff]   ;;  %v2393_v40 = vld [vmem:[%s2620_s28 + $0x2c] ss:$16 sps:$4 sm:$0xff]   ;;  %v404_v41 = vcombine.high %v2679_v53, %v2679_v53 }
  0x39   : > { %v2378_v31 = vld [vmem:[%s2620_s28 + $0x464] ss:$16 sps:$4 sm:$0xff]   ;;  %v2376_v33 = vld [vmem:[%s2620_s28 + $0x460] ss:$16 sps:$4 sm:$0xff]  }
  0x3a   : > { %1267 = vmatpush2.bf16.msra.mxu0 %v2313_v42  ;;  %v2384_v35 = vld [vmem:[%s2620_s28 + $0x444] ss:$16 sps:$4 sm:$0xff]   ;;  %v2382_v37 = vld [vmem:[%s2620_s28 + $0x440] ss:$16 sps:$4 sm:$0xff]  }
  0x3b   : > { %1308 = vmatpush2.bf16.msra.mxu1 %v2314_v45  ;;  %1268 = vmatprep.subr.bf16.mxu0 %v2315_v46  ;;  %v2390_v39 = vld [vmem:[%s2620_s28 + $0x424] ss:$16 sps:$4 sm:$0xff]   ;;  %v2388_v42 = vld [vmem:[%s2620_s28 + $0x420] ss:$16 sps:$4 sm:$0xff]   ;;  %v2399_v46 = vld [vmem:[%s2620_s28 + $0xc] ss:$16 sps:$4 sm:$0xff]  }
  0x3c   : > { %1309 = vmatprep.subr.bf16.mxu1 %v2317_v47  ;;  %v2396_v45 = vld [vmem:[%s2620_s28 + $0x404] ss:$16 sps:$4 sm:$0xff]   ;;  %v2394_v47 = vld [vmem:[%s2620_s28 + $0x400] ss:$16 sps:$4 sm:$0xff]  }
  0x3e   : > { %1269 = vmatpush2.bf16.msra.mxu0 %v2319_v48  ;;  %v418_v48 = vrot.slane %v404_v41, %v2670_v50  ;;  %v2483_v41 = vld [vmem:[%s2620_s28 + $0x44c] ss:$16 sps:$4 sm:$0xff]  }
  0x3f   : > { %1310 = vmatpush2.bf16.msra.mxu1 %v2320_v49  ;;  %1270 = vmatprep.subr.bf16.mxu0 %v2321_v51  ;;  %v2397_v49 = vld [vmem:[%s2620_s28 + $0x8] ss:$16 sps:$4 sm:$0xff]   ;;  %v2402_v51 = vld [vmem:[%s2620_s28 + $0x1ec] ss:$16 sps:$4 sm:$0xff]  }
  0x40   : > { %1311 = vmatprep.subr.bf16.mxu1 %v2323_v52  ;;  %v2405_v52 = vld [vmem:[%s2620_s28 + $0x2ec] ss:$16 sps:$4 sm:$0xff]   ;;  %v2753_v53 = vrot.slane %v418_v48, %v2670_v50  ;;  %v2409_v50 = vld [vmem:[%s2620_s28 + $0x2c8] ss:$16 sps:$4 sm:$0xff]  }
  0x41   : > { %v2487_v48 = vld [vmem:[%s2620_s28 + $0x428] ss:$16 sps:$4 sm:$0xff]  }
  0x42   : > { %1271 = vmatpush2.bf16.msra.mxu0 %v2325_v54  ;;  %v2400_v54 = vld [vmem:[%s2620_s28 + $0x1e8] ss:$16 sps:$4 sm:$0xff]  }
  0x43   : > { %1312 = vmatpush2.bf16.msra.mxu1 %v2326_v56  ;;  %1272 = vmatprep.subr.bf16.mxu0 %v2327_v57  ;;  %v2408_v56 = vld [vmem:[%s2620_s28 + $0x1cc] ss:$16 sps:$4 sm:$0xff]  }
  0x44   : > { %1313 = vmatprep.subr.bf16.mxu1 %v2329_v58  ;;  %v2411_v57 = vld [vmem:[%s2620_s28 + $0x2cc] ss:$16 sps:$4 sm:$0xff]   ;;  %v2406_v58 = vld [vmem:[%s2620_s28 + $0x1c8] ss:$16 sps:$4 sm:$0xff]  }
  0x46   : > { %1273 = vmatpush2.bf16.msra.mxu0 %v2331_v60  ;;  %v2417_v60 = vld [vmem:[%s2620_s28 + $0x2ac] ss:$16 sps:$4 sm:$0xff]  }
  0x47   : > { %1314 = vmatpush2.bf16.msra.mxu1 %v2332_v62  ;;  %1274 = vmatprep.subr.bf16.mxu0 %v2333_v63  ;;  %v2415_v62 = vld [vmem:[%s2620_s28 + $0x2a8] ss:$16 sps:$4 sm:$0xff]   ;;  %v2420_v63 = vld [vmem:[%s2620_s28 + $0x18c] ss:$16 sps:$4 sm:$0xff]  }
  0x48   : > { %1315 = vmatprep.subr.bf16.mxu1 %v2335_v0  ;;  %v2423_v0 = vld [vmem:[%s2620_s28 + $0x28c] ss:$16 sps:$4 sm:$0xff]  }
  0x4a   : > { %1275 = vmatpush2.bf16.msra.mxu0 %v2337_v2  ;;  %v2418_v2 = vld [vmem:[%s2620_s28 + $0x188] ss:$16 sps:$4 sm:$0xff]  }
  0x4b   : > { %1316 = vmatpush2.bf16.msra.mxu1 %v2338_v3  ;;  %1276 = vmatprep.subr.bf16.mxu0 %v2339_v4  ;;  %v2421_v3 = vld [vmem:[%s2620_s28 + $0x288] ss:$16 sps:$4 sm:$0xff]   ;;  %v2429_v4 = vld [vmem:[%s2620_s28 + $0x26c] ss:$16 sps:$4 sm:$0xff]  }
  0x4c   : > { %1317 = vmatprep.subr.bf16.mxu1 %v2341_v5  ;;  %v2424_v5 = vld [vmem:[%s2620_s28 + $0x168] ss:$16 sps:$4 sm:$0xff]  }
  0x4e   : > { %1277 = vmatpush2.bf16.msra.mxu0 %v2343_v6  ;;  %v2427_v6 = vld [vmem:[%s2620_s28 + $0x268] ss:$16 sps:$4 sm:$0xff]  }
  0x4f   : > { %1318 = vmatpush2.bf16.msra.mxu1 %v2344_v7  ;;  %1278 = vmatprep.subr.bf16.mxu0 %v2345_v8  ;;  %v2432_v7 = vld [vmem:[%s2620_s28 + $0x14c] ss:$16 sps:$4 sm:$0xff]  }
  0x50   : > { %1319 = vmatprep.subr.bf16.mxu1 %v2347_v9  ;;  %v2435_v8 = vld [vmem:[%s2620_s28 + $0x24c] ss:$16 sps:$4 sm:$0xff]   ;;  %v2430_v9 = vld [vmem:[%s2620_s28 + $0x148] ss:$16 sps:$4 sm:$0xff]  }
  0x52   : > { %1279 = vmatpush2.bf16.msra.mxu0 %v2349_v10  ;;  %v2433_v10 = vld [vmem:[%s2620_s28 + $0x248] ss:$16 sps:$4 sm:$0xff]  }
  0x53   : > { %1320 = vmatpush2.bf16.msra.mxu1 %v2350_v12  ;;  %1330 = vmatprep.subr.bf16.mxu0 %v2354_v13  ;;  %v2438_v12 = vld [vmem:[%s2620_s28 + $0x12c] ss:$16 sps:$4 sm:$0xff]  }
  0x54   : > { %1371 = vmatprep.subr.bf16.mxu1 %v2357_v14  ;;  %v2441_v13 = vld [vmem:[%s2620_s28 + $0x22c] ss:$16 sps:$4 sm:$0xff]   ;;  %v2436_v14 = vld [vmem:[%s2620_s28 + $0x128] ss:$16 sps:$4 sm:$0xff]  }
  0x55   : > { %1281 = vmatmul.mubr.bf16.vlgmr.msra.gmra.mxu0 %v2705_v11 }
  0x56   : > { %1322 = vmatmul.mubr.bf16.vlgmr.msra.gmra.mxu1 %v2712_v15  ;;  %1331 = vmatpush1.bf16.msra.mxu0 %v2352_v16  ;;  %v2439_v16 = vld [vmem:[%s2620_s28 + $0x228] ss:$16 sps:$4 sm:$0xff]  }
  0x57   : > { %1372 = vmatpush1.bf16.msra.mxu1 %v2355_v17  ;;  %1332 = vmatprep.subr.bf16.mxu0 %v2360_v18  ;;  %v2444_v17 = vld [vmem:[%s2620_s28 + $0x10c] ss:$16 sps:$4 sm:$0xff]  }
  0x58   : > { %1373 = vmatprep.subr.bf16.mxu1 %v2363_v19  ;;  %1362 = vmatprep.mubr.bf16.mxu0 %v2566_v24  ;;  %v2447_v18 = vld [vmem:[%s2620_s28 + $0x20c] ss:$16 sps:$4 sm:$0xff]   ;;  %v2442_v19 = vld [vmem:[%s2620_s28 + $0x108] ss:$16 sps:$4 sm:$0xff]  }
  0x59   : > { %1403 = vmatprep.mubr.bf16.mxu1 %v440_v61  ;;  %v2412_v61 = vld [vmem:[%s2620_s28 + $0x1a8] ss:$16 sps:$4 sm:$0xff]  }
  0x5a   : > { %1333 = vmatpush1.bf16.msra.mxu0 %v2358_v20  ;;  %v2445_v20 = vld [vmem:[%s2620_s28 + $0x208] ss:$16 sps:$4 sm:$0xff]  }
  0x5b   : > { %1374 = vmatpush1.bf16.msra.mxu1 %v2361_v21  ;;  %1334 = vmatprep.subr.bf16.mxu0 %v2366_v22  ;;  %v2450_v21 = vld [vmem:[%s2620_s28 + $0x3ec] ss:$16 sps:$4 sm:$0xff]  }
  0x5c   : > { %1375 = vmatprep.subr.bf16.mxu1 %v2369_v23  ;;  %v2453_v22 = vld [vmem:[%s2620_s28 + $0x4ec] ss:$16 sps:$4 sm:$0xff]   ;;  %v2448_v23 = vld [vmem:[%s2620_s28 + $0x3e8] ss:$16 sps:$4 sm:$0xff]  }
  0x5e   : > { %1335 = vmatpush1.bf16.msra.mxu0 %v2364_v25  ;;  %v2451_v25 = vld [vmem:[%s2620_s28 + $0x4e8] ss:$16 sps:$4 sm:$0xff]  }
  0x5f   : > { %1376 = vmatpush1.bf16.msra.mxu1 %v2367_v26  ;;  %1336 = vmatprep.subr.bf16.mxu0 %v2372_v27  ;;  %v2456_v26 = vld [vmem:[%s2620_s28 + $0x3cc] ss:$16 sps:$4 sm:$0xff]  }
  0x60   : > { %1377 = vmatprep.subr.bf16.mxu1 %v2375_v28  ;;  %v2459_v27 = vld [vmem:[%s2620_s28 + $0x4cc] ss:$16 sps:$4 sm:$0xff]   ;;  %v2454_v28 = vld [vmem:[%s2620_s28 + $0x3c8] ss:$16 sps:$4 sm:$0xff]  }
  0x62   : > { %1337 = vmatpush1.bf16.msra.mxu0 %v2370_v29  ;;  %v2457_v29 = vld [vmem:[%s2620_s28 + $0x4c8] ss:$16 sps:$4 sm:$0xff]  }
  0x63   : > { %1378 = vmatpush1.bf16.msra.mxu1 %v2373_v30  ;;  %1338 = vmatprep.subr.bf16.mxu0 %v2378_v31  ;;  %v2462_v30 = vld [vmem:[%s2620_s28 + $0x3ac] ss:$16 sps:$4 sm:$0xff]  }
  0x64   : > { %1379 = vmatprep.subr.bf16.mxu1 %v2381_v32  ;;  %v2465_v31 = vld [vmem:[%s2620_s28 + $0x4ac] ss:$16 sps:$4 sm:$0xff]   ;;  %v2460_v32 = vld [vmem:[%s2620_s28 + $0x3a8] ss:$16 sps:$4 sm:$0xff]  }
  0x66   : > { %1339 = vmatpush1.bf16.msra.mxu0 %v2376_v33  ;;  %v2468_v33 = vld [vmem:[%s2620_s28 + $0x38c] ss:$16 sps:$4 sm:$0xff]  }
  0x67   : > { %1380 = vmatpush1.bf16.msra.mxu1 %v2379_v34  ;;  %1340 = vmatprep.subr.bf16.mxu0 %v2384_v35  ;;  %v2471_v34 = vld [vmem:[%s2620_s28 + $0x48c] ss:$16 sps:$4 sm:$0xff]   ;;  %v2466_v35 = vld [vmem:[%s2620_s28 + $0x388] ss:$16 sps:$4 sm:$0xff]  }
  0x68   : > { %1381 = vmatprep.subr.bf16.mxu1 %v2387_v36  ;;  %v2469_v36 = vld [vmem:[%s2620_s28 + $0x488] ss:$16 sps:$4 sm:$0xff]  }
  0x6a   : > { %1341 = vmatpush1.bf16.msra.mxu0 %v2382_v37  ;;  %v2477_v37 = vld [vmem:[%s2620_s28 + $0x46c] ss:$16 sps:$4 sm:$0xff]  }
  0x6b   : > { %1382 = vmatpush1.bf16.msra.mxu1 %v2385_v38  ;;  %1342 = vmatprep.subr.bf16.mxu0 %v2390_v39  ;;  %v2472_v38 = vld [vmem:[%s2620_s28 + $0x368] ss:$16 sps:$4 sm:$0xff]  }
  0x6c   : > { %1383 = vmatprep.subr.bf16.mxu1 %v2393_v40  ;;  %v2475_v39 = vld [vmem:[%s2620_s28 + $0x468] ss:$16 sps:$4 sm:$0xff]   ;;  %v2480_v40 = vld [vmem:[%s2620_s28 + $0x34c] ss:$16 sps:$4 sm:$0xff]  }
  0x6e   : > { %1343 = vmatpush1.bf16.msra.mxu0 %v2388_v42  ;;  %v2478_v42 = vld [vmem:[%s2620_s28 + $0x348] ss:$16 sps:$4 sm:$0xff]  }
  0x6f   : > { %1384 = vmatpush1.bf16.msra.mxu1 %v2391_v43  ;;  %1344 = vmatprep.subr.bf16.mxu0 %v2396_v45  ;;  %v2481_v43 = vld [vmem:[%s2620_s28 + $0x448] ss:$16 sps:$4 sm:$0xff]   ;;  %v2486_v45 = vld [vmem:[%s2620_s28 + $0x32c] ss:$16 sps:$4 sm:$0xff]  }
  0x70   : > { %1385 = vmatprep.subr.bf16.mxu1 %v2399_v46  ;;  %v2489_v46 = vld [vmem:[%s2620_s28 + $0x42c] ss:$16 sps:$4 sm:$0xff]  }
  0x72   : > { %1345 = vmatpush1.bf16.msra.mxu0 %v2394_v47  ;;  %v2484_v47 = vld [vmem:[%s2620_s28 + $0x328] ss:$16 sps:$4 sm:$0xff]  }
  0x73   : > { %1386 = vmatpush1.bf16.msra.mxu1 %v2397_v49  ;;  %1412 = vmatprep.subr.bf16.mxu0 %v2405_v52  ;;  %v2492_v49 = vld [vmem:[%s2620_s28 + $0x30c] ss:$16 sps:$4 sm:$0xff]   ;;  %v2490_v52 = vld [vmem:[%s2620_s28 + $0x308] ss:$16 sps:$4 sm:$0xff]  }
  0x74   : > { %1387 = vmatprep.subr.bf16.mxu1 %v2402_v51  ;;  %v2495_v51 = vld [vmem:[%s2620_s28 + $0x40c] ss:$16 sps:$4 sm:$0xff]  }
  0x75   : > { %1363 = vmatmul.mubr.bf16.vlgmr.msra.gmra.mxu0 %v2753_v53 }
  0x76   : > { %1413 = vmatpush1.bf16.msra.mxu0 %v2403_v55  ;;  %1444 = vmatprep.mubr.bf16.mxu0 %v2692_v1  ;;  %v2426_v1 = vld [vmem:[%s2620_s28 + $0x16c] ss:$16 sps:$4 sm:$0xff]  }
  0x77   : > { %1388 = vmatpush2.bf16.msra.mxu1 %v2400_v54  ;;  %1414 = vmatprep.subr.bf16.mxu0 %v2411_v57  ;;  %v2493_v54 = vld [vmem:[%s2620_s28 + $0x408] ss:$16 sps:$4 sm:$0xff]  }
  0x78   : > { %1389 = vmatprep.subr.bf16.mxu1 %v2408_v56 }
  0x7a   : > { %1415 = vmatpush1.bf16.msra.mxu0 %v2409_v50 }
  0x7b   : > { %1390 = vmatpush2.bf16.msra.mxu1 %v2406_v58  ;;  %1416 = vmatprep.subr.bf16.mxu0 %v2417_v60 }
  0x7c   : > { %1391 = vmatprep.subr.bf16.mxu1 %v2414_v59 }
  0x7e   : > { %1417 = vmatpush1.bf16.msra.mxu0 %v2415_v62 }
  0x7f   : > { %1392 = vmatpush2.bf16.msra.mxu1 %v2412_v61  ;;  %1418 = vmatprep.subr.bf16.mxu0 %v2423_v0 }
  0x80   : > { %1393 = vmatprep.subr.bf16.mxu1 %v2420_v63 }
  0x82   : > { %1419 = vmatpush1.bf16.msra.mxu0 %v2421_v3 }
  0x83   : > { %1394 = vmatpush2.bf16.msra.mxu1 %v2418_v2  ;;  %1420 = vmatprep.subr.bf16.mxu0 %v2429_v4 }
  0x84   : > { %1395 = vmatprep.subr.bf16.mxu1 %v2426_v1 }
  0x86   : > { %1421 = vmatpush1.bf16.msra.mxu0 %v2427_v6 }
  0x87   : > { %1396 = vmatpush2.bf16.msra.mxu1 %v2424_v5  ;;  %1422 = vmatprep.subr.bf16.mxu0 %v2435_v8 }
  0x88   : > { %1397 = vmatprep.subr.bf16.mxu1 %v2432_v7 }
  0x8a   : > { %1423 = vmatpush1.bf16.msra.mxu0 %v2433_v10 }
  0x8b   : > { %1398 = vmatpush2.bf16.msra.mxu1 %v2430_v9  ;;  %1424 = vmatprep.subr.bf16.mxu0 %v2441_v13  ;;  %v2567_v9 = vmov 1983009808  }
  0x8c   : > { %1399 = vmatprep.subr.bf16.mxu1 %v2438_v12  ;;  %v1501_v10 = vunpack.c.l.s4 %v2567_v9 }
  0x8e   : > { %1425 = vmatpush1.bf16.msra.mxu0 %v2439_v16 }
  0x8f   : > { %1400 = vmatpush2.bf16.msra.mxu1 %v2436_v14  ;;  %1426 = vmatprep.subr.bf16.mxu0 %v2447_v18  ;;  %v1502_v14 = vunpack.c.0.s8 %v1501_v10 }
  0x90   : > { %1401 = vmatprep.subr.bf16.mxu1 %v2444_v17 }
  0x92   : > { %1427 = vmatpush1.bf16.msra.mxu0 %v2445_v20 }
  0x93   : > { %1402 = vmatpush2.bf16.msra.mxu1 %v2442_v19  ;;  %1428 = vmatprep.subr.bf16.mxu0 %v2450_v21 }
  0x94   : > { %1453 = vmatprep.subr.bf16.mxu1 %v2453_v22  ;;  %v2824_v22 = vsub.s32 %v1502_v14, %v2662_v44 }
  0x96   : > { %1404 = vmatmul.mubr.bf16.vlgmr.msra.gmra.mxu1 %v2705_v11  ;;  %1429 = vmatpush2.bf16.msra.mxu0 %v2448_v23  ;;  %v2463_v11 = vld [vmem:[%s2620_s28 + $0x4a8] ss:$16 sps:$4 sm:$0xff]  }
  0x97   : > { %1454 = vmatpush1.bf16.msra.mxu1 %v2451_v25  ;;  %1430 = vmatprep.subr.bf16.mxu0 %v2456_v26 }
  0x98   : > { %1455 = vmatprep.subr.bf16.mxu1 %v2459_v27  ;;  %1485 = vmatprep.mubr.bf16.mxu1 %v2566_v24  ;;  %v2474_v24 = vld [vmem:[%s2620_s28 + $0x36c] ss:$16 sps:$4 sm:$0xff]  }
  0x9a   : > { %1431 = vmatpush2.bf16.msra.mxu0 %v2454_v28 }
  0x9b   : > { %1456 = vmatpush1.bf16.msra.mxu1 %v2457_v29  ;;  %1432 = vmatprep.subr.bf16.mxu0 %v2462_v30 }
  0x9c   : > { %1457 = vmatprep.subr.bf16.mxu1 %v2465_v31  ;;  %v241_v31 = vld [vmem:[#allocation2] sm:$0xff] }
  0x9e   : > { %1433 = vmatpush2.bf16.msra.mxu0 %v2460_v32 }
  0x9f   : > { %1458 = vmatpush1.bf16.msra.mxu1 %v2463_v11  ;;  %1434 = vmatprep.subr.bf16.mxu0 %v2468_v33 }
  0xa0   : > { %1459 = vmatprep.subr.bf16.mxu1 %v2471_v34 }
  0xa2   : > { %1435 = vmatpush2.bf16.msra.mxu0 %v2466_v35 }
  0xa3   : > { %1460 = vmatpush1.bf16.msra.mxu1 %v2469_v36  ;;  %1436 = vmatprep.subr.bf16.mxu0 %v2474_v24 }
  0xa4   : > { %1461 = vmatprep.subr.bf16.mxu1 %v2477_v37 }
  0xa6   : > { %1437 = vmatpush2.bf16.msra.mxu0 %v2472_v38 }
  0xa7   : > { %1462 = vmatpush1.bf16.msra.mxu1 %v2475_v39  ;;  %1438 = vmatprep.subr.bf16.mxu0 %v2480_v40 }
  0xa8   : > { %1463 = vmatprep.subr.bf16.mxu1 %v2483_v41 }
  0xaa   : > { %1439 = vmatpush2.bf16.msra.mxu0 %v2478_v42 }
  0xab   : > { %1464 = vmatpush1.bf16.msra.mxu1 %v2481_v43  ;;  %1440 = vmatprep.subr.bf16.mxu0 %v2486_v45 }
  0xac   : > { %1465 = vmatprep.subr.bf16.mxu1 %v2489_v46 }
  0xae   : > { %1441 = vmatpush2.bf16.msra.mxu0 %v2484_v47 }
  0xaf   : > { %1466 = vmatpush1.bf16.msra.mxu1 %v2487_v48  ;;  %1442 = vmatprep.subr.bf16.mxu0 %v2492_v49 }
  0xb0   : > { %1467 = vmatprep.subr.bf16.mxu1 %v2495_v51 }
  0xb2   : > { %1443 = vmatpush2.bf16.msra.mxu0 %v2490_v52 }
  0xb3   : > { %1468 = vmatpush1.bf16.msra.mxu1 %v2493_v54 }
  0xb5   : > { %1445 = vmatmul.mubr.bf16.vlgmr.msra.gmra.mxu0 %v2712_v15 }
  0xb6   : > { %1486 = vmatmul.mubr.bf16.vlgmr.msra.gmra.mxu1 %v2753_v53 }
 0x115   : > { %v1282_v55 = vpop.f32.mrf.mxu0 }
 0x116   : > { %v1323_v56 = vpop.f32.mrf.mxu1 }
 0x117   : > { %v1324_v57 = vadd.f32 %v1323_v56, %v1282_v55  ;;  %v1284_v58 = vpop.f32.mrf.mxu0 }
 0x118   : > { %v1325_v50 = vpop.f32.mrf.mxu1 }
 0x119   : > { %v1326_v59 = vadd.f32 %v1325_v50, %v1284_v58  ;;  %v1286_v60 = vpop.f32.mrf.mxu0 }
 0x11a   : > { %v1327_v61 = vpop.f32.mrf.mxu1 }
 0x11b   : > { %v1287_v62 = vpop.f32.mrf.mxu0 }
 0x11c   : > { %v1328_v63 = vpop.f32.mrf.mxu1 }
 0x135   : > { %v1364_v0 = vpop.f32.mrf.mxu0 }
 0x136   : > { %v1365_v2 = vadd.f32 %v1364_v0, %v1324_v57 }
 0x137   : > { %v1366_v3 = vpop.f32.mrf.mxu0 }
 0x138   : > { %v1367_v1 = vadd.f32 %v1366_v3, %v1326_v59 }
 0x139   : > { %v1368_v4 = vpop.f32.mrf.mxu0 }
 0x13a   : > { %v1498_v5 = vcombine.low %v1365_v2, %v1367_v1 }
 0x13b   : > { %v1369_v6 = vpop.f32.mrf.mxu0 }
 0x13c   : > { %v1506_v29 = vrot.slane %v1498_v5, %v2824_v22 }
 0x156   : > { %v1405_v15 = vpop.f32.mrf.mxu1 }
 0x158   : > { %v1407_v7 = vpop.f32.mrf.mxu1 }
 0x15a   : > { %v1409_v53 = vpop.f32.mrf.mxu1 }
 0x15c   : > { %v1410_v8 = vpop.f32.mrf.mxu1 }
 0x175   : > { %v1446_v12 = vpop.f32.mrf.mxu0 }
 0x176   : > { %v1487_v13 = vpop.f32.mrf.mxu1  ;;  %v1447_v16 = vadd.f32 %v1446_v12, %v1405_v15 }
 0x177   : > { %v1448_v17 = vpop.f32.mrf.mxu0 }
 0x178   : > { %v1489_v18 = vpop.f32.mrf.mxu1  ;;  %v1449_v19 = vadd.f32 %v1448_v17, %v1407_v7  ;;  %v1488_v23 = vadd.f32 %v1487_v13, %v1447_v16 }
 0x179   : > { %v1450_v20 = vpop.f32.mrf.mxu0 }
 0x17a   : > { %v1491_v21 = vpop.f32.mrf.mxu1  ;;  %v1490_v25 = vadd.f32 %v1489_v18, %v1449_v19 }
 0x17b   : > { %v1451_v26 = vpop.f32.mrf.mxu0 }
 0x17c   : > { %v1492_v27 = vpop.f32.mrf.mxu1  ;;  %v1499_v28 = vcombine.low %v1488_v23, %v1490_v25 }
 0x17e   : > { %v1513_v30 = vrot.slane %v1499_v28, %v2824_v22 }
 0x180   : > { %v1514_v32 = vcombine.low %v1506_v29, %v1513_v30  ;;  %1521 = sbr.rel (%p2153_p6) target bundleno = 625 (0x271), region = 48 }
 0x182   : > { %v1516_v11 = vadd.f32 %v1514_v32, %v241_v31 }
 0x184   : > { %1517 = vst [vmem:[#allocation2] sm:$0xff] %v1516_v11 }
 0x185   : > { %v2496_v33 = vld [vmem:[%s2957_s3 + $0x78] sm:$0xff]   ;;  %v2500_v24 = vld [vmem:[%s2957_s3 + $0x70] sm:$0xff]   ;;  %v2504_v40 = vld [vmem:[%s2957_s3 + $0x68] sm:$0xff]   ;;  %v1527_v61 = vsub.s32 0, %v2662_v44  ;;  %v1531_v63 = vsub.s32 1, %v2662_v44  ;;  %v1535_v2 = vsub.s32 2, %v2662_v44 }
 0x186   : > { %v2497_v34 = vld [vmem:[%s2957_s3 + $0xf8] sm:$0xff]   ;;  %2192 = vmatprep.subr.bf16.mxu0 %v2496_v33  ;;  %v2501_v37 = vld [vmem:[%s2957_s3 + $0xf0] sm:$0xff]   ;;  %v2505_v41 = vld [vmem:[%s2957_s3 + $0xe8] sm:$0xff]   ;;  %v1539_v1 = vsub.s32 3, %v2662_v44 }
 0x187   : > { %v2498_v35 = vld [vmem:[%s2957_s3 + $0x38] sm:$0xff]   ;;  %2214 = vmatprep.subr.bf16.mxu1 %v2497_v34  ;;  %v2502_v38 = vld [vmem:[%s2957_s3 + $0x30] sm:$0xff]   ;;  %v2506_v42 = vld [vmem:[%s2957_s3 + $0x28] sm:$0xff]  }
 0x188   : > { %v2499_v36 = vld [vmem:[%s2957_s3 + $0xb8] sm:$0xff]   ;;  %2193 = vmatpush3.bf16.msra.mxu0 %v2498_v35  ;;  %v2503_v39 = vld [vmem:[%s2957_s3 + $0xb0] sm:$0xff]   ;;  %v2507_v43 = vld [vmem:[%s2957_s3 + $0xa8] sm:$0xff]  }
 0x189   : > { %2215 = vmatpush3.bf16.msra.mxu1 %v2499_v36  ;;  %2194 = vmatprep.subr.bf16.mxu0 %v2500_v24  ;;  %v2508_v45 = vld [vmem:[%s2957_s3 + $0x60] sm:$0xff]   ;;  %v2512_v49 = vld [vmem:[%s2957_s3 + $0x58] sm:$0xff]   ;;  %v2516_v55 = vld [vmem:[%s2957_s3 + $0x50] sm:$0xff]  }
 0x18a   : > { %2216 = vmatprep.subr.bf16.mxu1 %v2501_v37  ;;  %v2509_v46 = vld [vmem:[%s2957_s3 + $0xe0] sm:$0xff]   ;;  %v2513_v51 = vld [vmem:[%s2957_s3 + $0xd8] sm:$0xff]   ;;  %v2517_v56 = vld [vmem:[%s2957_s3 + $0xd0] sm:$0xff]  }
 0x18b   : > { %v2510_v47 = vld [vmem:[%s2957_s3 + $0x20] sm:$0xff]   ;;  %v2514_v52 = vld [vmem:[%s2957_s3 + $0x18] sm:$0xff]   ;;  %v2518_v57 = vld [vmem:[%s2957_s3 + $0x10] sm:$0xff]  }
 0x18c   : > { %2195 = vmatpush3.bf16.msra.mxu0 %v2502_v38  ;;  %v2511_v48 = vld [vmem:[%s2957_s3 + $0xa0] sm:$0xff]   ;;  %v2515_v54 = vld [vmem:[%s2957_s3 + $0x98] sm:$0xff]   ;;  %v2519_v58 = vld [vmem:[%s2957_s3 + $0x90] sm:$0xff]  }
 0x18d   : > { %2217 = vmatpush3.bf16.msra.mxu1 %v2503_v39  ;;  %2196 = vmatprep.subr.bf16.mxu0 %v2504_v40  ;;  %v2520_v50 = vld [vmem:[%s2957_s3 + $0x48] sm:$0xff]   ;;  %v2524_v0 = vld [vmem:[%s2957_s3 + $0x40] sm:$0xff]  }
 0x18e   : > { %2218 = vmatprep.subr.bf16.mxu1 %v2505_v41  ;;  %v2521_v59 = vld [vmem:[%s2957_s3 + $0xc8] sm:$0xff]   ;;  %v2525_v3 = vld [vmem:[%s2957_s3 + $0xc0] sm:$0xff]  }
 0x18f   : > { %v2522_v60 = vld [vmem:[%s2957_s3 + $0x8] sm:$0xff]   ;;  %v2526_v4 = vld [vmem:[%s2957_s3] sm:$0xff]  }
 0x190   : > { %2197 = vmatpush3.bf16.msra.mxu0 %v2506_v42  ;;  %v2523_v62 = vld [vmem:[%s2957_s3 + $0x88] sm:$0xff]   ;;  %v2527_v5 = vld [vmem:[%s2957_s3 + $0x80] sm:$0xff]  }
 0x191   : > { %2219 = vmatpush3.bf16.msra.mxu1 %v2507_v43  ;;  %2198 = vmatprep.subr.bf16.mxu0 %v2508_v45  ;;  %v1523_v6 = vld [vmem:[%s2956_s2] sm:$0xf] }
 0x192   : > { %2220 = vmatprep.subr.bf16.mxu1 %v2509_v46  ;;  %v1528_v15 = vrot.slane %v1523_v6, %v1527_v61  ;;  %v1532_v7 = vrot.slane %v1523_v6, %v1531_v63  ;;  %v1536_v53 = vrot.slane %v1523_v6, %v1535_v2  ;;  %v1540_v44 = vrot.slane %v1523_v6, %v1539_v1  ;;  %v1522_v13 = vld [vmem:[#allocation2] sm:$0xff] }
 0x193   : > { %v2154_v31 = vld [vmem:[%s2958_s4] ss:$0 sm:$0xff] }
 0x194   : > { %2199 = vmatpush3.bf16.msra.mxu0 %v2510_v47  ;;  %v1541_v8 = vcombine.low %v1528_v15, %v1532_v7  ;;  %v1542_v9 = vcombine.low %v1536_v53, %v1540_v44 }
 0x195   : > { %2221 = vmatpush3.bf16.msra.mxu1 %v2511_v48  ;;  %2200 = vmatprep.subr.bf16.mxu0 %v2512_v49 }
 0x196   : > { %2222 = vmatprep.subr.bf16.mxu1 %v2513_v51  ;;  %v1549_v10 = vrot.slane %v1541_v8, %v2824_v22  ;;  %v1556_v12 = vrot.slane %v1542_v9, %v2824_v22 }
 0x198   : > { %2201 = vmatpush3.bf16.msra.mxu0 %v2514_v52  ;;  %v1557_v14 = vcombine.low %v1549_v10, %v1556_v12 }
 0x199   : > { %2223 = vmatpush3.bf16.msra.mxu1 %v2515_v54  ;;  %2202 = vmatprep.subr.bf16.mxu0 %v2516_v55 }
 0x19a   : > { %2224 = vmatprep.subr.bf16.mxu1 %v2517_v56  ;;  %v1559_v16 = vadd.f32 %v1557_v14, %v1522_v13 }
 0x19c   : > { %2203 = vmatpush3.bf16.msra.mxu0 %v2518_v57  ;;  %v1560_v17 = vmax.f32 %v1559_v16, 0.0 }
 0x19d   : > { %2225 = vmatpush3.bf16.msra.mxu1 %v2519_v58  ;;  %2204 = vmatprep.subr.bf16.mxu0 %v2520_v50 }
 0x19e   : > { %2226 = vmatprep.subr.bf16.mxu1 %v2521_v59  ;;  %v1569_v18 = vrot.slane %v1560_v17, %v2824_v22  ;;  %v1562_v19 = vcombine.high %v1560_v17, %v1560_v17 }
 0x1a0   : > { %2205 = vmatpush3.bf16.msra.mxu0 %v2522_v60  ;;  %v1577_v20 = vcombine.high %v1569_v18, %v1569_v18  ;;  %v1576_v21 = vrot.slane %v1562_v19, %v2824_v22  ;;  %v1583_v23 = vpack.c.bf16 %v1569_v18, %v1569_v18 }
 0x1a1   : > { %2227 = vmatpush3.bf16.msra.mxu1 %v2523_v62  ;;  %2206 = vmatprep.subr.bf16.mxu0 %v2524_v0 }
 0x1a2   : > { %2228 = vmatprep.subr.bf16.mxu1 %v2525_v3  ;;  %v1584_v25 = vpack.c.bf16 %v1577_v20, %v1577_v20  ;;  %v1578_v26 = vcombine.high %v1576_v21, %v1576_v21  ;;  %v1585_v27 = vpack.c.bf16 %v1576_v21, %v1576_v21 }
 0x1a4   : > { %2207 = vmatpush3.bf16.msra.mxu0 %v2526_v4  ;;  %1882 = vmatprep.mubr.bf16.mxu0 %v1584_v25  ;;  %v1586_v28 = vpack.c.bf16 %v1578_v26, %v1578_v26 }
 0x1a5   : > { %2229 = vmatpush3.bf16.msra.mxu1 %v2527_v5 }
 0x1a6   : > { %1922 = vmatprep.mubr.bf16.mxu1 %v1586_v28 }
 0x1a7   : > { %1883 = vmatmul.mubr.bf16.vlgmr.msra.gmra.mxu0 %v1583_v23 }
 0x1a8   : > { %1923 = vmatmul.mubr.bf16.vlgmr.msra.gmra.mxu1 %v1585_v27 }
 0x267   : > { %v2208_v29 = vpop.f32.mrf.mxu0 }
 0x268   : > { %v2230_v30 = vpop.f32.mrf.mxu1 }
 0x269   : > { %v2209_v32 = vpop.f32.mrf.mxu0 }
 0x26a   : > { %v2210_v11 = vadd.f32 %v2209_v32, %v2208_v29  ;;  %v2231_v33 = vpop.f32.mrf.mxu1 }
 0x26b   : > { %v2211_v34 = vpop.f32.mrf.mxu0  ;;  %v2232_v35 = vadd.f32 %v2231_v33, %v2230_v30 }
 0x26c   : > { %v1885_v22 = vadd.f32 %v2210_v11, %v2154_v31  ;;  %v2233_v36 = vpop.f32.mrf.mxu1 }
 0x26d   : > { %v2212_v24 = vpop.f32.mrf.mxu0 }
 0x26e   : > { %v1925_v37 = vadd.f32 %v2232_v35, %v1885_v22  ;;  %v2234_v38 = vpop.f32.mrf.mxu1 }
 0x270   : > { %1930 = vst [vmem:[#allocation3] sm:$0x3] %v1925_v37 }
 0x271 PF: > { %p2240_p7 = scmp.eq.s32.totalorder %s2605_s19, 4  ;;  %s2568_s30 = smov [#allocation3]  }
 0x272   : > { %s1938_s6 = sshll.u32 %s2568_s30, 4  ;;  %s1939_s6 = int_to_ptr.vmem [resolvable:$true] %s1938_s6 }
 0x273   : > { %s2528_s7 = scalar_lea.vmem %s1939_s6, 32  ;;  %p2535_p11 = scmp.lt.s32.totalorder %s1939_s6, %s1939_s6 }
 0x274   : > { %p2529_p8 = scmp.ne.s32.totalorder %s1939_s6, %s2528_s7  ;;  %p2536_p12 = scmp.lt.s32.totalorder %s2528_s7, %s2528_s7 }
 0x276   : > { %p2530_p9 = pnand %p2529_p8, %p2240_p7  ;;  %p2537_p13 = por %p2536_p12, %p2535_p11 }
 0x278   : > { %p2531_p10 = pneg %p2530_p9 }
 0x27a   : > { %p2538_p0 = pnand %p2537_p13, %p2531_p10 }
 0x27c   : > { %2541 = shalt.err (!%p2538_p0)
}
 0x27d   : > { %2237 = dma.vmem_to_hbm [thread:$0]  (%p2240_p7), %s1939_s6, 32, %s2959_s5, [#allocation4]  }
 0x27e   : > { %2557 = dma.done.wait (%p2240_p7), [#allocation4], 32  }
 0x27f   : > { %2559 = vsyncadd (%p2240_p7), [#allocation4], 4294967264 }
 0x280 PF: > { %s16_s18 = sadd.s32 1, %s2562_s18  }
 0x281   : > { %p13_p1 = scmp.ge.s32.totalorder %s16_s18, 7  }
 0x283   :  { %15 = sbr.rel (!%p13_p1) target bundleno = 1 (0x1), region = 78 }
 0x288   :  { %1951 = vsyncpa [#allocation4], 1 }
 0x289   :  { %1953 = vsyncpa [#allocation4 + $0x1], 1 }

</bundles_post_ra>
